<compile_context>
chip_gen: v7x
topology: tpu7x:2x2x1
jax: 0.10.0
libtpu: 0.0.40
codegen_flags: <defaults>
</compile_context>

<pallas_src>
import functools

import jax
import jax.numpy as jnp
from jax.experimental import pallas as pl
from jax.experimental.pallas import tpu as pltpu


# ----------------------------------------------------------------------------
# Kernel
# ----------------------------------------------------------------------------
def _layernorm(x, gamma, beta, eps):
    # f32 statistics over the feature (last) dim.
    mu = jnp.mean(x, axis=-1, keepdims=True)
    var = jnp.mean((x - mu) ** 2, axis=-1, keepdims=True)
    return (x - mu) * jax.lax.rsqrt(var + eps) * gamma + beta


def transformer_layers_kernel(
    x_ref,
    wqkv_ref, bqkv_ref, wo_ref, bo_ref,
    w1_ref, b1_ref, w2_ref, b2_ref,
    g1_ref, be1_ref, g2_ref, be2_ref,
    gf_ref, bff_ref,
    o_ref,
    mask_scratch,
    *, eps, n_heads,
):
    layer = pl.program_id(1)
    n_layers = pl.num_programs(1)

    S, D = x_ref.shape
    H = n_heads
    hd = D // H
    bf16 = jnp.bfloat16

    # First layer of this batch-tile: init the VMEM-resident carry and build
    # the causal mask once (reused for all layers of this tile).
    @pl.when(layer == 0)
    def _():
        o_ref[...] = x_ref[...]
        row = jax.lax.broadcasted_iota(jnp.int32, (S, S), 0)
        col = jax.lax.broadcasted_iota(jnp.int32, (S, S), 1)
        mask_scratch[...] = jnp.where(col <= row, 0.0, -1e30).astype(jnp.float32)

    x = o_ref[...]                                           # (S, D) f32 residual stream

    # ---------------- self-attention block (pre-norm) -----------------------
    xn = _layernorm(x, g1_ref[0], be1_ref[0], eps).astype(bf16)          # (S, D)
    # Fused QKV: one wide (S,D) @ (D,3D) matmul; 1/sqrt(hd) folded into Q cols.
    qkv = jnp.dot(xn, wqkv_ref[0], preferred_element_type=jnp.float32)
    qkv = qkv + bqkv_ref[0]                                              # (S, 3D) f32

    q = jnp.swapaxes(qkv[:, :D].reshape(S, H, hd), 0, 1).astype(bf16)    # (H, S, hd)
    k = jnp.swapaxes(qkv[:, D:2 * D].reshape(S, H, hd), 0, 1).astype(bf16)
    v = jnp.swapaxes(qkv[:, 2 * D:].reshape(S, H, hd), 0, 1).astype(bf16)

    # Scores + additive causal mask (mask add stays f32).
    sc = jnp.einsum("hqd,hkd->hqk", q, k,
                    preferred_element_type=jnp.float32)                  # (H, S, S)
    sc = sc + mask_scratch[...][None]

    # Fused softmax: overwrite sc, single live (H,S,S) buffer, cast late.
    mx = jnp.max(sc, axis=-1, keepdims=True)
    sc = jnp.exp(sc - mx)
    denom = jnp.sum(sc, axis=-1, keepdims=True)
    pr = (sc * pl.reciprocal(denom, approx=False)).astype(bf16)          # (H, S, S)

    av = jnp.einsum("hqk,hkd->hqd", pr, v,
                    preferred_element_type=jnp.float32)                  # (H, S, hd)
    av = jnp.swapaxes(av, 0, 1).reshape(S, D).astype(bf16)               # (S, H*hd)

    # Single wide output projection (head reduction inside the MXU contraction).
    attn = jnp.dot(av, wo_ref[0], preferred_element_type=jnp.float32) + bo_ref[0]
    x = x + attn                                                         # residual (f32)

    # ---------------- feed-forward block (pre-norm) --------------------------
    xn2 = _layernorm(x, g2_ref[0], be2_ref[0], eps).astype(bf16)
    h1 = jnp.dot(xn2, w1_ref[0], preferred_element_type=jnp.float32) + b1_ref[0]
    h1 = jnp.maximum(h1, 0.0).astype(bf16)                               # ReLU
    ff = jnp.dot(h1, w2_ref[0], preferred_element_type=jnp.float32) + b2_ref[0]
    x = x + ff                                                           # residual (f32)

    # ---------------- write carry / final LayerNorm on last layer ------------
    @pl.when(layer == n_layers - 1)
    def _():
        o_ref[...] = _layernorm(x, gf_ref[...], bff_ref[...], eps)

    @pl.when(layer != n_layers - 1)
    def _():
        o_ref[...] = x


# ----------------------------------------------------------------------------
# Host-side weight preparation (one-time transposes / stacking / bf16 cast).
# Call ONCE and reuse the result across forward calls.
# ----------------------------------------------------------------------------
def prepare_kernel_params(params, n_heads):
    """PyTorch-layout params -> fused, (in,out)-ordered, layer-stacked tensors."""
    D = params["layers"][0]["in_proj_w"].shape[1]
    hd = D // n_heads
    scale = 1.0 / jnp.sqrt(jnp.float32(hd))
    bf16 = jnp.bfloat16

    def stack(fn):
        return jnp.stack([fn(p) for p in params["layers"]])

    def qkv_w(p):
        # in_proj_weight is (3D, D): rows [q | k | v]. Transpose to (in,out)
        # and fuse into one (D, 3D) matrix; fold softmax scale into Q columns.
        wq = p["in_proj_w"][:D].T * scale
        wk = p["in_proj_w"][D:2 * D].T
        wv = p["in_proj_w"][2 * D:].T
        return jnp.concatenate([wq, wk, wv], axis=1).astype(bf16)        # (D, 3D)

    def qkv_b(p):
        bq = p["in_proj_b"][:D] * scale
        bk = p["in_proj_b"][D:2 * D]
        bv = p["in_proj_b"][2 * D:]
        return jnp.concatenate([bq, bk, bv]).reshape(1, 3 * D)           # (1, 3D) f32

    wqkv = stack(qkv_w)                                                  # (L, D, 3D) bf16
    bqkv = stack(qkv_b)                                                  # (L, 1, 3D) f32
    wo = stack(lambda p: p["out_proj_w"].T.astype(bf16))                 # (L, D, D)
    bo = stack(lambda p: p["out_proj_b"].reshape(1, D))
    w1 = stack(lambda p: p["lin1_w"].T.astype(bf16))                     # (L, D, F)
    b1 = stack(lambda p: p["lin1_b"].reshape(1, -1))
    w2 = stack(lambda p: p["lin2_w"].T.astype(bf16))                     # (L, F, D)
    b2 = stack(lambda p: p["lin2_b"].reshape(1, D))
    g1 = stack(lambda p: p["norm1_w"].reshape(1, D))
    be1 = stack(lambda p: p["norm1_b"].reshape(1, D))
    g2 = stack(lambda p: p["norm2_w"].reshape(1, D))
    be2 = stack(lambda p: p["norm2_b"].reshape(1, D))
    gf = params["normf_w"].reshape(1, D)
    bff = params["normf_b"].reshape(1, D)
    return (wqkv, bqkv, wo, bo, w1, b1, w2, b2, g1, be1, g2, be2, gf, bff)


# ----------------------------------------------------------------------------
# Wrapper
# ----------------------------------------------------------------------------
def _layer_spec(a):
    nd = a.ndim
    return pl.BlockSpec((1,) + tuple(a.shape[1:]),
                        lambda b, l, _nd=nd: (l,) + (0,) * (_nd - 1))


def _shared_spec(a):
    nd = a.ndim
    return pl.BlockSpec(tuple(a.shape), lambda b, l, _nd=nd: (0,) * _nd)


def transformer_forward(x, kernel_params, n_heads, eps=1e-5):
    """Mirrors Transformer.forward with get_attns=False (attns -> None).

    `kernel_params` must be the output of prepare_kernel_params (hoisted out
    of the per-call path)."""
    (wqkv, bqkv, wo, bo, w1, b1, w2, b2,
     g1, be1, g2, be2, gf, bff) = kernel_params
    B, S, D = x.shape
    n_layers = wqkv.shape[0]

    # Flatten the activation carry at the boundary (no in-kernel reshapes).
    x_flat = x.reshape(B * S, D)

    layer_args = (wqkv, bqkv, wo, bo, w1, b1, w2, b2, g1, be1, g2, be2)
    in_specs = ([pl.BlockSpec((S, D), lambda b, l: (b, 0))]
                + [_layer_spec(a) for a in layer_args]
                + [_shared_spec(gf), _shared_spec(bff)])

    out_flat = pl.pallas_call(
        functools.partial(transformer_layers_kernel, eps=eps, n_heads=n_heads),
        out_shape=jax.ShapeDtypeStruct((B * S, D), jnp.float32),
        grid=(B, n_layers),
        in_specs=in_specs,
        out_specs=pl.BlockSpec((S, D), lambda b, l: (b, 0)),
        scratch_shapes=[pltpu.VMEM((S, S), jnp.float32)],
        compiler_params=pltpu.CompilerParams(
            dimension_semantics=("parallel", "arbitrary"),
            vmem_limit_bytes=32 * 1024 * 1024,
        ),
    )(x_flat, *layer_args, gf, bff)
    return out_flat.reshape(B, S, D), None


# ----------------------------------------------------------------------------
# Pure-JAX reference (PyTorch semantics, f32 end-to-end)
# ----------------------------------------------------------------------------
def _ref_forward(x, params, n_heads, eps=1e-5):
    B, S, D = x.shape
    hd = D // n_heads
    i = jnp.arange(S)
    mask = jnp.where(i[None, :] > i[:, None], -jnp.inf, 0.0)

    def ln(v, g, b):
        mu = v.mean(-1, keepdims=True)
        var = ((v - mu) ** 2).mean(-1, keepdims=True)
        return (v - mu) / jnp.sqrt(var + eps) * g + b

    for p in params["layers"]:
        xn = ln(x, p["norm1_w"], p["norm1_b"])
        qkv = xn @ p["in_proj_w"].T + p["in_proj_b"]
        q, k, v = jnp.split(qkv, 3, axis=-1)
        q = q.reshape(B, S, n_heads, hd).transpose(0, 2, 1, 3)
        k = k.reshape(B, S, n_heads, hd).transpose(0, 2, 1, 3)
        v = v.reshape(B, S, n_heads, hd).transpose(0, 2, 1, 3)
        sc = jnp.einsum("bhqd,bhkd->bhqk", q, k) / jnp.sqrt(hd) + mask
        pr = jax.nn.softmax(sc, axis=-1)
        o = jnp.einsum("bhqk,bhkd->bhqd", pr, v).transpose(0, 2, 1, 3).reshape(B, S, D)
        x = x + (o @ p["out_proj_w"].T + p["out_proj_b"])
        xn2 = ln(x, p["norm2_w"], p["norm2_b"])
        h = jnp.maximum(xn2 @ p["lin1_w"].T + p["lin1_b"], 0.0)
        x = x + (h @ p["lin2_w"].T + p["lin2_b"])
    return ln(x, params["normf_w"], params["normf_b"])


# ----------------------------------------------------------------------------
# Parameter init (PyTorch layout) + main
# ----------------------------------------------------------------------------
def init_params(key, n_layers, D, F):
    layers = []
    s = 0.05
    for _ in range(n_layers):
        key, *ks = jax.random.split(key, 13)
        layers.append(dict(
            in_proj_w=jax.random.normal(ks[0], (3 * D, D), jnp.float32) * s,
            in_proj_b=jax.random.normal(ks[1], (3 * D,), jnp.float32) * s,
            out_proj_w=jax.random.normal(ks[2], (D, D), jnp.float32) * s,
            out_proj_b=jax.random.normal(ks[3], (D,), jnp.float32) * s,
            lin1_w=jax.random.normal(ks[4], (F, D), jnp.float32) * s,
            lin1_b=jax.random.normal(ks[5], (F,), jnp.float32) * s,
            lin2_w=jax.random.normal(ks[6], (D, F), jnp.float32) * s,
            lin2_b=jax.random.normal(ks[7], (D,), jnp.float32) * s,
            norm1_w=1.0 + 0.2 * jax.random.normal(ks[8], (D,), jnp.float32),
            norm1_b=0.2 * jax.random.normal(ks[9], (D,), jnp.float32),
            norm2_w=1.0 + 0.2 * jax.random.normal(ks[10], (D,), jnp.float32),
            norm2_b=0.2 * jax.random.normal(ks[11], (D,), jnp.float32),
        ))
    return dict(
        layers=layers,
        normf_w=jnp.ones((D,), jnp.float32),
        normf_b=jnp.zeros((D,), jnp.float32),
    )


if __name__ == "__main__":
    # model_params: dim=32, n_heads=4, dim_ff_factor=2, n_layers=2, norm_first=True
    B, S, D, H, N_LAYERS = 2, 8, 32, 4, 2
    F = D * 2

    key = jax.random.PRNGKey(0)
    kx, kp = jax.random.split(key)
    x = jax.random.normal(kx, (B, S, D), jnp.float32)
    params = init_params(kp, N_LAYERS, D, F)

    # Hoisted: prepare fused / stacked / bf16 weights once.
    kernel_params = jax.tree_util.tree_map(
        jax.block_until_ready, prepare_kernel_params(params, n_heads=H))

    out, attns = transformer_forward(x, kernel_params, n_heads=H)
    out = jax.block_until_ready(out)

    ref = _ref_forward(x, params, n_heads=H)
    assert out.shape == (B, S, D)
    assert attns is None
    err = float(jnp.max(jnp.abs(out - ref)))
    # bf16 matmul inputs (f32 accumulation) -> loosened tolerance.
    assert err < 2e-2, f"max abs err {err}"

    print("KERNEL_OK")
</pallas_src>

<mosaic_0001>
module attributes {stable_mosaic.version = 11 : i64} {
  func.func @transformer_layers_kernel(%arg0: i32, %arg1: i32, %arg2: memref<8x32xf32, #tpu.memory_space<vmem>>, %arg3: memref<1x32x96xbf16, #tpu.memory_space<vmem>>, %arg4: memref<1x1x96xf32, #tpu.memory_space<vmem>>, %arg5: memref<1x32x32xbf16, #tpu.memory_space<vmem>>, %arg6: memref<1x1x32xf32, #tpu.memory_space<vmem>>, %arg7: memref<1x32x64xbf16, #tpu.memory_space<vmem>>, %arg8: memref<1x1x64xf32, #tpu.memory_space<vmem>>, %arg9: memref<1x64x32xbf16, #tpu.memory_space<vmem>>, %arg10: memref<1x1x32xf32, #tpu.memory_space<vmem>>, %arg11: memref<1x1x32xf32, #tpu.memory_space<vmem>>, %arg12: memref<1x1x32xf32, #tpu.memory_space<vmem>>, %arg13: memref<1x1x32xf32, #tpu.memory_space<vmem>>, %arg14: memref<1x1x32xf32, #tpu.memory_space<vmem>>, %arg15: memref<1x32xf32, #tpu.memory_space<vmem>>, %arg16: memref<1x32xf32, #tpu.memory_space<vmem>>, %arg17: memref<8x32xf32, #tpu.memory_space<vmem>>, %arg18: memref<8x8xf32, #tpu.memory_space<vmem>>) attributes {dimension_semantics = [#tpu.dimension_semantics<parallel>, #tpu.dimension_semantics<arbitrary>], iteration_bounds = array<i64: 2, 2>, scalar_prefetch = 0 : i64, scratch_operands = 1 : i64, tpu.core_type = #tpu.core_type<tc>, window_params = [{transform_indices = @transform_0, window_bounds = array<i64: 8, 32>}, {transform_indices = @transform_1, window_bounds = array<i64: 1, 32, 96>}, {transform_indices = @transform_2, window_bounds = array<i64: 1, 1, 96>}, {transform_indices = @transform_3, window_bounds = array<i64: 1, 32, 32>}, {transform_indices = @transform_4, window_bounds = array<i64: 1, 1, 32>}, {transform_indices = @transform_5, window_bounds = array<i64: 1, 32, 64>}, {transform_indices = @transform_6, window_bounds = array<i64: 1, 1, 64>}, {transform_indices = @transform_7, window_bounds = array<i64: 1, 64, 32>}, {transform_indices = @transform_8, window_bounds = array<i64: 1, 1, 32>}, {transform_indices = @transform_9, window_bounds = array<i64: 1, 1, 32>}, {transform_indices = @transform_10, window_bounds = array<i64: 1, 1, 32>}, {transform_indices = @transform_11, window_bounds = array<i64: 1, 1, 32>}, {transform_indices = @transform_12, window_bounds = array<i64: 1, 1, 32>}, {pipeline_mode = #tpu.pipeline_mode<synchronous>, transform_indices = @transform_13, window_bounds = array<i64: 1, 32>}, {pipeline_mode = #tpu.pipeline_mode<synchronous>, transform_indices = @transform_14, window_bounds = array<i64: 1, 32>}, {transform_indices = @transform_15, window_bounds = array<i64: 8, 32>}]} {
    %c0_i32 = arith.constant 0 : i32
    %0 = arith.cmpi eq, %arg1, %c0_i32 : i32
    %1 = arith.extui %0 : i1 to i32
    %c0_i32_0 = arith.constant 0 : i32
    %2 = arith.cmpi ne, %1, %c0_i32_0 : i32
    scf.if %2 {
      %c0_61 = arith.constant 0 : index
      %c0_62 = arith.constant 0 : index
      %129 = vector.load %arg2[%c0_61, %c0_62] : memref<8x32xf32, #tpu.memory_space<vmem>>, vector<8x32xf32>
      %c0_63 = arith.constant 0 : index
      %c0_64 = arith.constant 0 : index
      %130 = vector.load %arg17[%c0_63, %c0_64] : memref<8x32xf32, #tpu.memory_space<vmem>>, vector<8x32xf32>
      tpu.vector_store %arg17[%c0_63, %c0_64], %129 {strides = array<i32>} : memref<8x32xf32, #tpu.memory_space<vmem>>, vector<8x32xf32>,
      %131 = tpu.iota {dimensions = array<i32: 0>} : vector<8x8xi32>
      %132 = tpu.iota {dimensions = array<i32: 1>} : vector<8x8xi32>
      %133 = arith.cmpi sle, %132, %131 : vector<8x8xi32>
      %cst_65 = arith.constant 0.000000e+00 : f32
      %cst_66 = arith.constant -1.000000e+30 : f32
      %134 = vector.broadcast %cst_65 : f32 to vector<8x8xf32>
      %135 = vector.broadcast %cst_66 : f32 to vector<8x8xf32>
      %136 = arith.select %133, %134, %135 : vector<8x8xi1>, vector<8x8xf32>
      %c0_67 = arith.constant 0 : index
      %c0_68 = arith.constant 0 : index
      %137 = vector.load %arg18[%c0_67, %c0_68] : memref<8x8xf32, #tpu.memory_space<vmem>>, vector<8x8xf32>
      tpu.vector_store %arg18[%c0_67, %c0_68], %136 {strides = array<i32>} : memref<8x8xf32, #tpu.memory_space<vmem>>, vector<8x8xf32>,
    } else {
    }
    %c0 = arith.constant 0 : index
    %c0_1 = arith.constant 0 : index
    %3 = vector.load %arg17[%c0, %c0_1] : memref<8x32xf32, #tpu.memory_space<vmem>>, vector<8x32xf32>
    %c0_2 = arith.constant 0 : index
    %c0_3 = arith.constant 0 : index
    %c0_4 = arith.constant 0 : index
    %4 = vector.load %arg11[%c0_2, %c0_3, %c0_4] : memref<1x1x32xf32, #tpu.memory_space<vmem>>, vector<1x1x32xf32>
    %5 = vector.shape_cast %4 : vector<1x1x32xf32> to vector<1x32xf32>
    %c0_5 = arith.constant 0 : index
    %c0_6 = arith.constant 0 : index
    %c0_7 = arith.constant 0 : index
    %6 = vector.load %arg12[%c0_5, %c0_6, %c0_7] : memref<1x1x32xf32, #tpu.memory_space<vmem>>, vector<1x1x32xf32>
    %7 = vector.shape_cast %6 : vector<1x1x32xf32> to vector<1x32xf32>
    %cst = arith.constant dense<0.000000e+00> : vector<8xf32>
    %8 = vector.multi_reduction <add>, %3, %cst [1] : vector<8x32xf32> to vector<8xf32>
    %9 = vector.shape_cast %8 : vector<8xf32> to vector<8x1xf32>
    %cst_8 = arith.constant 3.200000e+01 : f32
    %10 = vector.broadcast %cst_8 : f32 to vector<8x1xf32>
    %11 = arith.divf %9, %10 : vector<8x1xf32>
    %12 = vector.broadcast %11 : vector<8x1xf32> to vector<8x32xf32>
    %13 = arith.subf %3, %12 : vector<8x32xf32>
    %14 = arith.mulf %13, %13 : vector<8x32xf32>
    %cst_9 = arith.constant dense<0.000000e+00> : vector<8xf32>
    %15 = vector.multi_reduction <add>, %14, %cst_9 [1] : vector<8x32xf32> to vector<8xf32>
    %16 = vector.shape_cast %15 : vector<8xf32> to vector<8x1xf32>
    %cst_10 = arith.constant 3.200000e+01 : f32
    %17 = vector.broadcast %cst_10 : f32 to vector<8x1xf32>
    %18 = arith.divf %16, %17 : vector<8x1xf32>
    %19 = vector.broadcast %11 : vector<8x1xf32> to vector<8x32xf32>
    %20 = arith.subf %3, %19 : vector<8x32xf32>
    %cst_11 = arith.constant 9.99999974E-6 : f32
    %21 = vector.broadcast %cst_11 : f32 to vector<8x1xf32>
    %22 = arith.addf %18, %21 : vector<8x1xf32>
    %23 = math.rsqrt %22 : vector<8x1xf32>
    %24 = vector.broadcast %23 : vector<8x1xf32> to vector<8x32xf32>
    %25 = arith.mulf %20, %24 : vector<8x32xf32>
    %26 = vector.broadcast %5 : vector<1x32xf32> to vector<8x32xf32>
    %27 = arith.mulf %25, %26 : vector<8x32xf32>
    %28 = vector.broadcast %7 : vector<1x32xf32> to vector<8x32xf32>
    %29 = arith.addf %27, %28 : vector<8x32xf32>
    %30 = arith.truncf %29 : vector<8x32xf32> to vector<8x32xbf16>
    %c0_12 = arith.constant 0 : index
    %c0_13 = arith.constant 0 : index
    %c0_14 = arith.constant 0 : index
    %31 = vector.load %arg3[%c0_12, %c0_13, %c0_14] : memref<1x32x96xbf16, #tpu.memory_space<vmem>>, vector<1x32x96xbf16>
    %32 = vector.shape_cast %31 : vector<1x32x96xbf16> to vector<32x96xbf16>
    %cst_15 = arith.constant dense<0.000000e+00> : vector<8x96xf32>
    %33 = tpu.matmul %30, %32, %cst_15 {dimension_numbers = #tpu.dot_dimension_numbers<[1], [0], [0], [1], [0, 0, 1, 1], [], []>} : vector<8x32xbf16>, vector<32x96xbf16>, vector<8x96xf32> -> vector<8x96xf32>
    %c0_16 = arith.constant 0 : index
    %c0_17 = arith.constant 0 : index
    %c0_18 = arith.constant 0 : index
    %34 = vector.load %arg4[%c0_16, %c0_17, %c0_18] : memref<1x1x96xf32, #tpu.memory_space<vmem>>, vector<1x1x96xf32>
    %35 = vector.shape_cast %34 : vector<1x1x96xf32> to vector<1x96xf32>
    %36 = vector.broadcast %35 : vector<1x96xf32> to vector<8x96xf32>
    %37 = arith.addf %33, %36 : vector<8x96xf32>
    %38 = vector.extract_strided_slice %37 {offsets = [0, 0], sizes = [8, 32], strides = [1, 1]} : vector<8x96xf32> to vector<8x32xf32>
    %39 = vector.shape_cast %38 : vector<8x32xf32> to vector<8x4x8xf32>
    %40 = tpu.transpose %39, [1, 0, 2] : vector<8x4x8xf32> -> vector<4x8x8xf32>
    %41 = arith.truncf %40 : vector<4x8x8xf32> to vector<4x8x8xbf16>
    %42 = vector.extract_strided_slice %37 {offsets = [0, 32], sizes = [8, 32], strides = [1, 1]} : vector<8x96xf32> to vector<8x32xf32>
    %43 = vector.shape_cast %42 : vector<8x32xf32> to vector<8x4x8xf32>
    %44 = tpu.transpose %43, [1, 0, 2] : vector<8x4x8xf32> -> vector<4x8x8xf32>
    %45 = arith.truncf %44 : vector<4x8x8xf32> to vector<4x8x8xbf16>
    %46 = vector.extract_strided_slice %37 {offsets = [0, 64], sizes = [8, 32], strides = [1, 1]} : vector<8x96xf32> to vector<8x32xf32>
    %47 = vector.shape_cast %46 : vector<8x32xf32> to vector<8x4x8xf32>
    %48 = tpu.transpose %47, [1, 0, 2] : vector<8x4x8xf32> -> vector<4x8x8xf32>
    %49 = arith.truncf %48 : vector<4x8x8xf32> to vector<4x8x8xbf16>
    "tpu.trace_start"() <{level = 10 : i32, message = "hqd,hkd->hqk"}> : () -> ()
    %cst_19 = arith.constant dense<0.000000e+00> : vector<4x8x8xf32>
    %50 = tpu.matmul %41, %45, %cst_19 {dimension_numbers = #tpu.dot_dimension_numbers<[2], [2], [1], [1], [0, 0, 0, 1, 1, 1], [0], [0]>} : vector<4x8x8xbf16>, vector<4x8x8xbf16>, vector<4x8x8xf32> -> vector<4x8x8xf32>
    "tpu.trace_stop"() : () -> ()
    %c0_20 = arith.constant 0 : index
    %c0_21 = arith.constant 0 : index
    %51 = vector.load %arg18[%c0_20, %c0_21] : memref<8x8xf32, #tpu.memory_space<vmem>>, vector<8x8xf32>
    %52 = vector.shape_cast %51 : vector<8x8xf32> to vector<1x8x8xf32>
    %53 = vector.broadcast %52 : vector<1x8x8xf32> to vector<4x8x8xf32>
    %54 = arith.addf %50, %53 : vector<4x8x8xf32>
    %cst_22 = arith.constant dense<0xFF800000> : vector<4x8xf32>
    %55 = vector.multi_reduction <maximumf>, %54, %cst_22 [2] : vector<4x8x8xf32> to vector<4x8xf32>
    %56 = vector.shape_cast %55 : vector<4x8xf32> to vector<4x8x1xf32>
    %57 = vector.broadcast %56 : vector<4x8x1xf32> to vector<4x8x8xf32>
    %58 = arith.subf %54, %57 : vector<4x8x8xf32>
    %59 = math.exp %58 : vector<4x8x8xf32>
    %cst_23 = arith.constant dense<0.000000e+00> : vector<4x8xf32>
    %60 = vector.multi_reduction <add>, %59, %cst_23 [2] : vector<4x8x8xf32> to vector<4x8xf32>
    %61 = vector.shape_cast %60 : vector<4x8xf32> to vector<4x8x1xf32>
    %62 = tpu.reciprocal %61 : vector<4x8x1xf32> -> vector<4x8x1xf32>
    %63 = vector.broadcast %62 : vector<4x8x1xf32> to vector<4x8x8xf32>
    %64 = arith.mulf %59, %63 : vector<4x8x8xf32>
    %65 = arith.truncf %64 : vector<4x8x8xf32> to vector<4x8x8xbf16>
    "tpu.trace_start"() <{level = 10 : i32, message = "hqk,hkd->hqd"}> : () -> ()
    %cst_24 = arith.constant dense<0.000000e+00> : vector<4x8x8xf32>
    %66 = tpu.matmul %65, %49, %cst_24 {dimension_numbers = #tpu.dot_dimension_numbers<[2], [1], [1], [2], [0, 0, 0, 1, 1, 2], [0], [0]>} : vector<4x8x8xbf16>, vector<4x8x8xbf16>, vector<4x8x8xf32> -> vector<4x8x8xf32>
    "tpu.trace_stop"() : () -> ()
    %67 = tpu.transpose %66, [1, 0, 2] : vector<4x8x8xf32> -> vector<8x4x8xf32>
    %68 = vector.shape_cast %67 : vector<8x4x8xf32> to vector<8x32xf32>
    %69 = arith.truncf %68 : vector<8x32xf32> to vector<8x32xbf16>
    %c0_25 = arith.constant 0 : index
    %c0_26 = arith.constant 0 : index
    %c0_27 = arith.constant 0 : index
    %70 = vector.load %arg5[%c0_25, %c0_26, %c0_27] : memref<1x32x32xbf16, #tpu.memory_space<vmem>>, vector<1x32x32xbf16>
    %71 = vector.shape_cast %70 : vector<1x32x32xbf16> to vector<32x32xbf16>
    %cst_28 = arith.constant dense<0.000000e+00> : vector<8x32xf32>
    %72 = tpu.matmul %69, %71, %cst_28 {dimension_numbers = #tpu.dot_dimension_numbers<[1], [0], [0], [1], [0, 0, 1, 1], [], []>} : vector<8x32xbf16>, vector<32x32xbf16>, vector<8x32xf32> -> vector<8x32xf32>
    %c0_29 = arith.constant 0 : index
    %c0_30 = arith.constant 0 : index
    %c0_31 = arith.constant 0 : index
    %73 = vector.load %arg6[%c0_29, %c0_30, %c0_31] : memref<1x1x32xf32, #tpu.memory_space<vmem>>, vector<1x1x32xf32>
    %74 = vector.shape_cast %73 : vector<1x1x32xf32> to vector<1x32xf32>
    %75 = vector.broadcast %74 : vector<1x32xf32> to vector<8x32xf32>
    %76 = arith.addf %72, %75 : vector<8x32xf32>
    %77 = arith.addf %3, %76 : vector<8x32xf32>
    %c0_32 = arith.constant 0 : index
    %c0_33 = arith.constant 0 : index
    %c0_34 = arith.constant 0 : index
    %78 = vector.load %arg13[%c0_32, %c0_33, %c0_34] : memref<1x1x32xf32, #tpu.memory_space<vmem>>, vector<1x1x32xf32>
    %79 = vector.shape_cast %78 : vector<1x1x32xf32> to vector<1x32xf32>
    %c0_35 = arith.constant 0 : index
    %c0_36 = arith.constant 0 : index
    %c0_37 = arith.constant 0 : index
    %80 = vector.load %arg14[%c0_35, %c0_36, %c0_37] : memref<1x1x32xf32, #tpu.memory_space<vmem>>, vector<1x1x32xf32>
    %81 = vector.shape_cast %80 : vector<1x1x32xf32> to vector<1x32xf32>
    %cst_38 = arith.constant dense<0.000000e+00> : vector<8xf32>
    %82 = vector.multi_reduction <add>, %77, %cst_38 [1] : vector<8x32xf32> to vector<8xf32>
    %83 = vector.shape_cast %82 : vector<8xf32> to vector<8x1xf32>
    %cst_39 = arith.constant 3.200000e+01 : f32
    %84 = vector.broadcast %cst_39 : f32 to vector<8x1xf32>
    %85 = arith.divf %83, %84 : vector<8x1xf32>
    %86 = vector.broadcast %85 : vector<8x1xf32> to vector<8x32xf32>
    %87 = arith.subf %77, %86 : vector<8x32xf32>
    %88 = arith.mulf %87, %87 : vector<8x32xf32>
    %cst_40 = arith.constant dense<0.000000e+00> : vector<8xf32>
    %89 = vector.multi_reduction <add>, %88, %cst_40 [1] : vector<8x32xf32> to vector<8xf32>
    %90 = vector.shape_cast %89 : vector<8xf32> to vector<8x1xf32>
    %cst_41 = arith.constant 3.200000e+01 : f32
    %91 = vector.broadcast %cst_41 : f32 to vector<8x1xf32>
    %92 = arith.divf %90, %91 : vector<8x1xf32>
    %93 = vector.broadcast %85 : vector<8x1xf32> to vector<8x32xf32>
    %94 = arith.subf %77, %93 : vector<8x32xf32>
    %cst_42 = arith.constant 9.99999974E-6 : f32
    %95 = vector.broadcast %cst_42 : f32 to vector<8x1xf32>
    %96 = arith.addf %92, %95 : vector<8x1xf32>
    %97 = math.rsqrt %96 : vector<8x1xf32>
    %98 = vector.broadcast %97 : vector<8x1xf32> to vector<8x32xf32>
    %99 = arith.mulf %94, %98 : vector<8x32xf32>
    %100 = vector.broadcast %79 : vector<1x32xf32> to vector<8x32xf32>
    %101 = arith.mulf %99, %100 : vector<8x32xf32>
    %102 = vector.broadcast %81 : vector<1x32xf32> to vector<8x32xf32>
    %103 = arith.addf %101, %102 : vector<8x32xf32>
    %104 = arith.truncf %103 : vector<8x32xf32> to vector<8x32xbf16>
    %c0_43 = arith.constant 0 : index
    %c0_44 = arith.constant 0 : index
    %c0_45 = arith.constant 0 : index
    %105 = vector.load %arg7[%c0_43, %c0_44, %c0_45] : memref<1x32x64xbf16, #tpu.memory_space<vmem>>, vector<1x32x64xbf16>
    %106 = vector.shape_cast %105 : vector<1x32x64xbf16> to vector<32x64xbf16>
    %cst_46 = arith.constant dense<0.000000e+00> : vector<8x64xf32>
    %107 = tpu.matmul %104, %106, %cst_46 {dimension_numbers = #tpu.dot_dimension_numbers<[1], [0], [0], [1], [0, 0, 1, 1], [], []>} : vector<8x32xbf16>, vector<32x64xbf16>, vector<8x64xf32> -> vector<8x64xf32>
    %c0_47 = arith.constant 0 : index
    %c0_48 = arith.constant 0 : index
    %c0_49 = arith.constant 0 : index
    %108 = vector.load %arg8[%c0_47, %c0_48, %c0_49] : memref<1x1x64xf32, #tpu.memory_space<vmem>>, vector<1x1x64xf32>
    %109 = vector.shape_cast %108 : vector<1x1x64xf32> to vector<1x64xf32>
    %110 = vector.broadcast %109 : vector<1x64xf32> to vector<8x64xf32>
    %111 = arith.addf %107, %110 : vector<8x64xf32>
    %cst_50 = arith.constant 0.000000e+00 : f32
    %112 = vector.broadcast %cst_50 : f32 to vector<8x64xf32>
    %113 = arith.maximumf %111, %112 : vector<8x64xf32>
    %114 = arith.truncf %113 : vector<8x64xf32> to vector<8x64xbf16>
    %c0_51 = arith.constant 0 : index
    %c0_52 = arith.constant 0 : index
    %c0_53 = arith.constant 0 : index
    %115 = vector.load %arg9[%c0_51, %c0_52, %c0_53] : memref<1x64x32xbf16, #tpu.memory_space<vmem>>, vector<1x64x32xbf16>
    %116 = vector.shape_cast %115 : vector<1x64x32xbf16> to vector<64x32xbf16>
    %cst_54 = arith.constant dense<0.000000e+00> : vector<8x32xf32>
    %117 = tpu.matmul %114, %116, %cst_54 {dimension_numbers = #tpu.dot_dimension_numbers<[1], [0], [0], [1], [0, 0, 1, 1], [], []>} : vector<8x64xbf16>, vector<64x32xbf16>, vector<8x32xf32> -> vector<8x32xf32>
    %c0_55 = arith.constant 0 : index
    %c0_56 = arith.constant 0 : index
    %c0_57 = arith.constant 0 : index
    %118 = vector.load %arg10[%c0_55, %c0_56, %c0_57] : memref<1x1x32xf32, #tpu.memory_space<vmem>>, vector<1x1x32xf32>
    %119 = vector.shape_cast %118 : vector<1x1x32xf32> to vector<1x32xf32>
    %120 = vector.broadcast %119 : vector<1x32xf32> to vector<8x32xf32>
    %121 = arith.addf %117, %120 : vector<8x32xf32>
    %122 = arith.addf %77, %121 : vector<8x32xf32>
    %c1_i32 = arith.constant 1 : i32
    %123 = arith.cmpi eq, %arg1, %c1_i32 : i32
    %124 = arith.extui %123 : i1 to i32
    %c0_i32_58 = arith.constant 0 : i32
    %125 = arith.cmpi ne, %124, %c0_i32_58 : i32
    scf.if %125 {
      %c0_61 = arith.constant 0 : index
      %c0_62 = arith.constant 0 : index
      %129 = vector.load %arg15[%c0_61, %c0_62] : memref<1x32xf32, #tpu.memory_space<vmem>>, vector<1x32xf32>
      %c0_63 = arith.constant 0 : index
      %c0_64 = arith.constant 0 : index
      %130 = vector.load %arg16[%c0_63, %c0_64] : memref<1x32xf32, #tpu.memory_space<vmem>>, vector<1x32xf32>
      %cst_65 = arith.constant dense<0.000000e+00> : vector<8xf32>
      %131 = vector.multi_reduction <add>, %122, %cst_65 [1] : vector<8x32xf32> to vector<8xf32>
      %132 = vector.shape_cast %131 : vector<8xf32> to vector<8x1xf32>
      %cst_66 = arith.constant 3.200000e+01 : f32
      %133 = vector.broadcast %cst_66 : f32 to vector<8x1xf32>
      %134 = arith.divf %132, %133 : vector<8x1xf32>
      %135 = vector.broadcast %134 : vector<8x1xf32> to vector<8x32xf32>
      %136 = arith.subf %122, %135 : vector<8x32xf32>
      %137 = arith.mulf %136, %136 : vector<8x32xf32>
      %cst_67 = arith.constant dense<0.000000e+00> : vector<8xf32>
      %138 = vector.multi_reduction <add>, %137, %cst_67 [1] : vector<8x32xf32> to vector<8xf32>
      %139 = vector.shape_cast %138 : vector<8xf32> to vector<8x1xf32>
      %cst_68 = arith.constant 3.200000e+01 : f32
      %140 = vector.broadcast %cst_68 : f32 to vector<8x1xf32>
      %141 = arith.divf %139, %140 : vector<8x1xf32>
      %142 = vector.broadcast %134 : vector<8x1xf32> to vector<8x32xf32>
      %143 = arith.subf %122, %142 : vector<8x32xf32>
      %cst_69 = arith.constant 9.99999974E-6 : f32
      %144 = vector.broadcast %cst_69 : f32 to vector<8x1xf32>
      %145 = arith.addf %141, %144 : vector<8x1xf32>
      %146 = math.rsqrt %145 : vector<8x1xf32>
      %147 = vector.broadcast %146 : vector<8x1xf32> to vector<8x32xf32>
      %148 = arith.mulf %143, %147 : vector<8x32xf32>
      %149 = vector.broadcast %129 : vector<1x32xf32> to vector<8x32xf32>
      %150 = arith.mulf %148, %149 : vector<8x32xf32>
      %151 = vector.broadcast %130 : vector<1x32xf32> to vector<8x32xf32>
      %152 = arith.addf %150, %151 : vector<8x32xf32>
      %c0_70 = arith.constant 0 : index
      %c0_71 = arith.constant 0 : index
      %153 = vector.load %arg17[%c0_70, %c0_71] : memref<8x32xf32, #tpu.memory_space<vmem>>, vector<8x32xf32>
      tpu.vector_store %arg17[%c0_70, %c0_71], %152 {strides = array<i32>} : memref<8x32xf32, #tpu.memory_space<vmem>>, vector<8x32xf32>,
    } else {
    }
    %c1_i32_59 = arith.constant 1 : i32
    %126 = arith.cmpi ne, %arg1, %c1_i32_59 : i32
    %127 = arith.extui %126 : i1 to i32
    %c0_i32_60 = arith.constant 0 : i32
    %128 = arith.cmpi ne, %127, %c0_i32_60 : i32
    scf.if %128 {
      %c0_61 = arith.constant 0 : index
      %c0_62 = arith.constant 0 : index
      %129 = vector.load %arg17[%c0_61, %c0_62] : memref<8x32xf32, #tpu.memory_space<vmem>>, vector<8x32xf32>
      tpu.vector_store %arg17[%c0_61, %c0_62], %122 {strides = array<i32>} : memref<8x32xf32, #tpu.memory_space<vmem>>, vector<8x32xf32>,
    } else {
    }
    return
  }
  func.func @transform_0(%arg0: i32, %arg1: i32) -> (i32, i32) {
    %c0_i32 = arith.constant 0 : i32
    %c0_i32_0 = arith.constant 0 : i32
    return %arg0, %c0_i32 : i32, i32
  }
  func.func @transform_1(%arg0: i32, %arg1: i32) -> (i32, i32, i32) {
    %c0_i32 = arith.constant 0 : i32
    %c0_i32_0 = arith.constant 0 : i32
    %c0_i32_1 = arith.constant 0 : i32
    return %arg1, %c0_i32, %c0_i32_0 : i32, i32, i32
  }
  func.func @transform_2(%arg0: i32, %arg1: i32) -> (i32, i32, i32) {
    %c0_i32 = arith.constant 0 : i32
    %c0_i32_0 = arith.constant 0 : i32
    %c0_i32_1 = arith.constant 0 : i32
    return %arg1, %c0_i32, %c0_i32_0 : i32, i32, i32
  }
  func.func @transform_3(%arg0: i32, %arg1: i32) -> (i32, i32, i32) {
    %c0_i32 = arith.constant 0 : i32
    %c0_i32_0 = arith.constant 0 : i32
    %c0_i32_1 = arith.constant 0 : i32
    return %arg1, %c0_i32, %c0_i32_0 : i32, i32, i32
  }
  func.func @transform_4(%arg0: i32, %arg1: i32) -> (i32, i32, i32) {
    %c0_i32 = arith.constant 0 : i32
    %c0_i32_0 = arith.constant 0 : i32
    %c0_i32_1 = arith.constant 0 : i32
    return %arg1, %c0_i32, %c0_i32_0 : i32, i32, i32
  }
  func.func @transform_5(%arg0: i32, %arg1: i32) -> (i32, i32, i32) {
    %c0_i32 = arith.constant 0 : i32
    %c0_i32_0 = arith.constant 0 : i32
    %c0_i32_1 = arith.constant 0 : i32
    return %arg1, %c0_i32, %c0_i32_0 : i32, i32, i32
  }
  func.func @transform_6(%arg0: i32, %arg1: i32) -> (i32, i32, i32) {
    %c0_i32 = arith.constant 0 : i32
    %c0_i32_0 = arith.constant 0 : i32
    %c0_i32_1 = arith.constant 0 : i32
    return %arg1, %c0_i32, %c0_i32_0 : i32, i32, i32
  }
  func.func @transform_7(%arg0: i32, %arg1: i32) -> (i32, i32, i32) {
    %c0_i32 = arith.constant 0 : i32
    %c0_i32_0 = arith.constant 0 : i32
    %c0_i32_1 = arith.constant 0 : i32
    return %arg1, %c0_i32, %c0_i32_0 : i32, i32, i32
  }
  func.func @transform_8(%arg0: i32, %arg1: i32) -> (i32, i32, i32) {
    %c0_i32 = arith.constant 0 : i32
    %c0_i32_0 = arith.constant 0 : i32
    %c0_i32_1 = arith.constant 0 : i32
    return %arg1, %c0_i32, %c0_i32_0 : i32, i32, i32
  }
  func.func @transform_9(%arg0: i32, %arg1: i32) -> (i32, i32, i32) {
    %c0_i32 = arith.constant 0 : i32
    %c0_i32_0 = arith.constant 0 : i32
    %c0_i32_1 = arith.constant 0 : i32
    return %arg1, %c0_i32, %c0_i32_0 : i32, i32, i32
  }
  func.func @transform_10(%arg0: i32, %arg1: i32) -> (i32, i32, i32) {
    %c0_i32 = arith.constant 0 : i32
    %c0_i32_0 = arith.constant 0 : i32
    %c0_i32_1 = arith.constant 0 : i32
    return %arg1, %c0_i32, %c0_i32_0 : i32, i32, i32
  }
  func.func @transform_11(%arg0: i32, %arg1: i32) -> (i32, i32, i32) {
    %c0_i32 = arith.constant 0 : i32
    %c0_i32_0 = arith.constant 0 : i32
    %c0_i32_1 = arith.constant 0 : i32
    return %arg1, %c0_i32, %c0_i32_0 : i32, i32, i32
  }
  func.func @transform_12(%arg0: i32, %arg1: i32) -> (i32, i32, i32) {
    %c0_i32 = arith.constant 0 : i32
    %c0_i32_0 = arith.constant 0 : i32
    %c0_i32_1 = arith.constant 0 : i32
    return %arg1, %c0_i32, %c0_i32_0 : i32, i32, i32
  }
  func.func @transform_13(%arg0: i32, %arg1: i32) -> (i32, i32) {
    %c0_i32 = arith.constant 0 : i32
    %c0_i32_0 = arith.constant 0 : i32
    %c0_i32_1 = arith.constant 0 : i32
    return %c0_i32, %c0_i32_0 : i32, i32
  }
  func.func @transform_14(%arg0: i32, %arg1: i32) -> (i32, i32) {
    %c0_i32 = arith.constant 0 : i32
    %c0_i32_0 = arith.constant 0 : i32
    %c0_i32_1 = arith.constant 0 : i32
    return %c0_i32, %c0_i32_0 : i32, i32
  }
  func.func @transform_15(%arg0: i32, %arg1: i32) -> (i32, i32) {
    %c0_i32 = arith.constant 0 : i32
    %c0_i32_0 = arith.constant 0 : i32
    return %arg0, %c0_i32 : i32, i32
  }
}

</mosaic_0001>

<bundles_post_ra>
// kernel: tpu_custom_call.1
= control target key start
LH: loop header
LB: loop body
LE: loop exit
PB: predicated region body
PF: predicated region fallthrough
CT: control target
= control target key end

     0   :  { %s3391_s0 = inlined_call_operand.hbm [shape: f32[16,32], index: 0, kind: input, shape index: {}]   ;;  %s3392_s1 = inlined_call_operand.vmem [shape: bf16[2,32,96], index: 1, kind: input, shape index: {}]   ;;  %s3393_s2 = inlined_call_operand.vmem [shape: f32[2,1,96], index: 2, kind: input, shape index: {}]   ;;  %s3394_s3 = inlined_call_operand.vmem [shape: bf16[2,32,32], index: 3, kind: input, shape index: {}]   ;;  %s3395_s4 = inlined_call_operand.vmem [shape: f32[2,1,32], index: 4, kind: input, shape index: {}]   ;;  %s3396_s5 = inlined_call_operand.vmem [shape: bf16[2,32,64], index: 5, kind: input, shape index: {}]   ;;  %s3397_s6 = inlined_call_operand.vmem [shape: f32[2,1,64], index: 6, kind: input, shape index: {}]   ;;  %s3398_s7 = inlined_call_operand.vmem [shape: bf16[2,64,32], index: 7, kind: input, shape index: {}]   ;;  %s3399_s8 = inlined_call_operand.vmem [shape: f32[2,1,32], index: 8, kind: input, shape index: {}]   ;;  %s3400_s9 = inlined_call_operand.vmem [shape: f32[2,1,32], index: 9, kind: input, shape index: {}]   ;;  %s3401_s10 = inlined_call_operand.vmem [shape: f32[2,1,32], index: 10, kind: input, shape index: {}]   ;;  %s3402_s11 = inlined_call_operand.vmem [shape: f32[2,1,32], index: 11, kind: input, shape index: {}]   ;;  %s3403_s12 = inlined_call_operand.vmem [shape: f32[2,1,32], index: 12, kind: input, shape index: {}]   ;;  %s3404_s13 = inlined_call_operand.vmem [shape: f32[1,32], index: 13, kind: input, shape index: {}]   ;;  %s3405_s14 = inlined_call_operand.vmem [shape: f32[1,32], index: 14, kind: input, shape index: {}]   ;;  %s3406_s15 = inlined_call_operand.hbm [shape: f32[16,32], index: 15, kind: output, shape index: {}]  }
   0x1   :  { %3421 = sst [smem:[#allocation22_spill]] %s3391_s0 }
   0x2   :  { %3422 = sst [smem:[#allocation23_spill]] %s3392_s1 }
   0x3   :  { %3423 = sst [smem:[#allocation24_spill]] %s3394_s3 }
   0x4   :  { %3424 = sst [smem:[#allocation25_spill]] %s3396_s5 }
   0x5   :  { %3425 = sst [smem:[#allocation26_spill]] %s3397_s6 }
   0x6   :  { %3426 = sst [smem:[#allocation27_spill]] %s3398_s7 }
   0x7   :  { %3427 = sst [smem:[#allocation28_spill]] %s3403_s12 }
   0x8   :  { %3428 = sst [smem:[#allocation29_spill]] %s3404_s13 }
   0x9   :  { %3429 = sst [smem:[#allocation30_spill]] %s3405_s14 }
   0xa   :  { %3430 = sst [smem:[#allocation31_spill]] %s3406_s15 }
   0xb   :  { %20 = vsyncpa [#allocation4], 0 }
   0xc   :  { %22 = vsyncpa [#allocation4 + $0x1], 0 }
   0xd   :  { %23 = vsyncpa [#allocation5], 0 }
   0xe   :  { %25 = vsyncpa [#allocation5 + $0x1], 0  ;;  %s2889_s18 = smov 0   ;;  %s2891_s19 = smov 0  }
   0xf   :  { %s2893_s20 = smov 0   ;;  %s2895_s21 = smov 0  }
  0x10   :  { %s2897_s22 = smov 0   ;;  %s2899_s23 = smov 0  }
  0x11   :  { %s2901_s24 = smov 0   ;;  %s2903_s25 = smov 0  }
  0x12 LB: > { %3431 = sst [smem:[#allocation9_spill]] %s2764_s18  ;;  %s2359_s26 = sadd.s32 4294967295, %s2792_s25   ;;  %s2792_s25 = sphi %s2903_s25, %s31_s25   ;;  %s2788_s24 = sphi %s2901_s24, %s3480_s24   ;;  %s2784_s23 = sphi %s2899_s23, %s3479_s23   ;;  %s2780_s22 = sphi %s2897_s22, %s3478_s22   ;;  %s2776_s21 = sphi %s2895_s21, %s3477_s21   ;;  %s2772_s20 = sphi %s2893_s20, %s3476_s20   ;;  %s2768_s19 = sphi %s2891_s19, %s3475_s19   ;;  %s2764_s18 = sphi %s2889_s18, %s3474_s18  }
  0x13   : > { %3432 = sst [smem:[#allocation10_spill]] %s2768_s19  ;;  %s2360_s27 = sadd.s32 4294967294, %s2792_s25  }
  0x14   : > { %3433 = sst [smem:[#allocation11_spill]] %s2772_s20  ;;  %s40_s28 = sadd.s32 1, %s2784_s23 }
  0x15   : > { %3434 = sst [smem:[#allocation12_spill]] %s2780_s22  ;;  %s43_s29 = sadd.s32 1, %s2788_s24 }
  0x16   : > { %3435 = sst [smem:[#allocation13_spill]] %s2784_s23  ;;  %p41_p0 = scmp.ge.s32.totalorder %s40_s28, 2 }
  0x17   : > { %3436 = sst [smem:[#allocation14_spill]] %s2788_s24  ;;  %s50_s30 = sadd.s32 1, %s2772_s20 }
  0x18   : > { %3437 = sst [smem:[#allocation15_spill]] %s2792_s25  ;;  %p57_p1 = scmp.ne.s32.totalorder %s2772_s20, %s2768_s19 }
  0x19   : > { %p58_p2 = scmp.eq.s32.totalorder %s2792_s25, 0  ;;  %s3482_s28 = smov (%p41_p0, %s40_s28), 0 }
  0x1a   : > { %3438 = sst [smem:[#allocation16_spill]] %s3482_s28  ;;  %s3484_s29 = smov (!%p41_p0, %s43_s29), %s2788_s24 }
  0x1b   : > { %p2940_p3 = por %p58_p2, %p57_p1  ;;  %p63_p4 = scmp.ne.s32.totalorder %s2768_s19, %s2764_s18 }
  0x1c   : > { %p45_p5 = scmp.ge.s32.totalorder %s3484_s29, 2  ;;  %p64_p6 = scmp.eq.s32.totalorder %s2359_s26, 0 }
  0x1d   : > { %p441_p7 = scmp.eq.s32.totalorder %s2359_s26, 3  ;;  %p447_p8 = scmp.eq.s32.totalorder %s2360_s27, 3 }
  0x1e   : > { %s3486_s29 = smov (%p45_p5, %s3484_s29), 0  ;;  %p2948_p9 = por %p64_p6, %p63_p4 }
  0x1f   : > { %3440 = sst [smem:[#allocation17_spill]] %s3486_s29  ;;  %p2952_p10 = por %p441_p7, %p57_p1 }
  0x20   : > { %s47_s23 = ssub.s32 %s2788_s24, %s3486_s29  ;;  %p2958_p11 = por %p447_p8, %p63_p4 }
  0x21   : > { %s3442_s28 = scalar_select %p2952_p10, 1, 0 }
  0x22   : > { %s3444_s18 = scalar_select %p2958_p11, 1, 0 }
  0x23   : > { %3443 = sst [smem:[#allocation18_spill]] %s3442_s28  ;;  %p48_p12 = scmp.eq.s32.totalorder %s47_s23, 0 }
  0x24   : > { %3445 = sst [smem:[#allocation19_spill]] %s3444_s18  ;;  %p2553_p13 = scmp.lt.s32.totalorder %s2792_s25, 4 }
  0x25   : > { %s473_s26 = sand.u32 1, %s2772_s20   ;;  %s2364_s22 = sshll.u32 %s2788_s24, 7 }
  0x26   : > { %s2965_s27 = scalar_select %p48_p12, %s2772_s20, %s50_s30  }
  0x27   : > { %s2363_s15 = sshll.u32 %s473_s26, 3  ;;  %s3447_s0 = sld [smem:[#allocation22_spill]] }
  0x28   : > { %3446 = sst [smem:[#allocation20_spill]] %s2965_s27  ;;  %s477_s29 = scalar_lea.vmem [#allocation3], %s2363_s15 }
  0x29   : > { %s484_s28 = sshll.u32 %s477_s29, 4  ;;  %p2977_p0 = pnand %p2553_p13, %p2940_p3  ;;  %s2973_s28 = int_to_ptr.vmem [resolvable:$true] %s484_s28 }
  0x2a   : > { %s474_s13 = scalar_lea.sflag [#allocation4], %s473_s26 }
  0x2b   : > { %p2666_p5 = pneg %p2977_p0 }
  0x2d   : > { %s2971_s12 = scalar_lea.hbm %s3447_s0, %s2364_s22  ;;  %s2669_s29 = scalar_lea.hbm %s3447_s0, 256 }
  0x2e   : > { %s2664_s14 = scalar_lea.hbm %s2971_s12, 128  ;;  %p2670_p3 = scmp.lt.u32.totalorder %s2971_s12, %s3447_s0 }
  0x2f   : > { %p2665_p4 = scmp.ne.s32.totalorder %s2971_s12, %s2664_s14  ;;  %p2671_p8 = scmp.lt.u32.totalorder %s2669_s29, %s2664_s14 }
  0x30   : > { %p2673_p13 = scmp.lt.u32.totalorder %s2664_s14, %s2971_s12 }
  0x31   : > { %p2667_p6 = pnand %p2666_p5, %p2665_p4  ;;  %p2672_p12 = por %p2671_p8, %p2670_p3 }
  0x33   : > { %p2668_p7 = pneg %p2667_p6  ;;  %p2674_p1 = por %p2673_p13, %p2672_p12 }
  0x35   : > { %p2675_p2 = pnand %p2674_p1, %p2668_p7 }
  0x37   : > { %2678 = shalt.err (!%p2675_p2)
}
  0x38   : > { %s2679_s26 = scalar_lea.vmem %s2973_s28, 128  ;;  %s2794_s15 = smov [#allocation3]  }
  0x39   : > { %p2680_p4 = scmp.ne.s32.totalorder %s2973_s28, %s2679_s26  ;;  %s2684_s22 = sshll.u32 %s2794_s15, 4  ;;  %s2685_s22 = int_to_ptr.vmem [resolvable:$false] %s2684_s22 }
  0x3a   : > { %s2686_s30 = scalar_lea.vmem %s2685_s22, 256  ;;  %p2687_p10 = scmp.lt.s32.totalorder %s2973_s28, %s2685_s22 }
  0x3b   : > { %p2682_p6 = pnand %p2680_p4, %p2666_p5  ;;  %p2688_p3 = scmp.lt.s32.totalorder %s2686_s30, %s2679_s26 }
  0x3d   : > { %p2683_p11 = pneg %p2682_p6  ;;  %p2689_p8 = por %p2688_p3, %p2687_p10 }
  0x3f   : > { %p2690_p12 = pnand %p2689_p8, %p2683_p11 }
  0x41   : > { %2693 = shalt.err (!%p2690_p12)
}
  0x42   : > { %2548 = dma.hbm_to_vmem [thread:$0]  (!%p2977_p0), %s2971_s12, 128, %s2973_s28, %s474_s13  }
  0x43   : > { %p3449_p1 = scmp.lt.s32.totalorder %s2792_s25, 5  ;;  %p3450_p2 = scmp.ge.s32.totalorder %s2792_s25, 1 }
  0x45   : > { %p570_p5 = pnand %p3450_p2, %p3449_p1 }
  0x47   : > { %573 = sbr.rel (%p570_p5) target bundleno = 3151 (0xc4f), region = 80 }
  0x4e   : > { %s3013_s14 = sand.u32 1, %s2768_s19  }
  0x4f   : > { %3451 = sst [smem:[#allocation21_spill]] %s3013_s14  ;;  %s2366_s29 = sshll.u32 %s3013_s14, 3 }
  0x50   : > { %s576_s16 = scalar_lea.sflag [#allocation4], %s3013_s14  ;;  %s579_s26 = scalar_lea.vmem [#allocation3], %s2366_s29 }
  0x51   : > { %2755 = dma.done.wait (%p2948_p9), %s576_s16, 128  }
  0x52   : > { %2757 = vsyncadd (%p2948_p9), %s576_s16, 4294967168  ;;  %p670_p10 = scmp.lt.s32.totalorder %s2776_s21, 1  ;;  %s3452_s1 = sld [smem:[#allocation23_spill]] }
  0x53   : > { %s3453_s3 = sld [smem:[#allocation24_spill]]  ;;  %s3454_s5 = sld [smem:[#allocation25_spill]] }
  0x54   : > { %s3023_s12 = scalar_select %p670_p10, %s2776_s21, 1 }
  0x55   : > { %s3456_s7 = sld [smem:[#allocation27_spill]]  ;;  %s3457_s17 = sld [smem:[#allocation28_spill]] }
  0x56   : > { %s2423_s28 = sshll.u32 %s3023_s12, 4  ;;  %s2426_s22 = sshll.u32 %s3023_s12, 5 }
  0x57   : > { %s701_s20 = scalar_lea.vmem %s3399_s8, %s3023_s12  ;;  %s704_s18 = scalar_lea.vmem %s3400_s9, %s3023_s12 }
  0x58   : > { %s3033_s30 = scalar_lea.vmem %s3452_s1, %s2423_s28  ;;  %s710_s15 = scalar_lea.vmem %s3402_s11, %s3023_s12 }
  0x59   : > { %s3038_s24 = scalar_lea.vmem %s3453_s3, %s2423_s28  ;;  %s3047_s14 = scalar_lea.vmem %s3454_s5, %s2423_s28 }
  0x5a   : > { %s707_s5 = scalar_lea.vmem %s3401_s10, %s3023_s12  ;;  %p2376_p9 = scmp.ne.s32.totalorder %s2776_s21, 0 }
  0x5b   : > { %s3057_s0 = scalar_lea.vmem %s3456_s7, %s2426_s22  ;;  %s713_s22 = scalar_lea.vmem %s3457_s17, %s3023_s12  ;;  %v719_v0 = vld [vmem:[%s579_s26] sm:$0xff] (!%p2376_p9)  ;;  %vm720_vm0 = vcmask (!%p2376_p9), 261120   ;;  %v722_v1 = vlaneseq (!%p2376_p9)  ;;  %vm728_vm1 = vcmask (!%p2376_p9), 64512   ;;  %v2795_v4 = vmov (!%p2376_p9), -1e+30  }
  0x5c   : > { %s3079_s7 = scalar_lea.vmem [#allocation6], %s2366_s29  ;;  %718 = sbr.rel (%p2376_p9) target bundleno = 99 (0x63), region = 88 }
  0x5d   : > { %721 = vst.msk [vmem:[%s3079_s7] sm:$0xff] (!%p2376_p9), %vm720_vm0, %v719_v0  ;;  %v723_v2 = vshrl.u32 (!%p2376_p9), %v722_v1, 7  ;;  %v725_v3 = vand.u32 (!%p2376_p9), 127, %v722_v1 }
  0x5f   : > { %vm726_vm2 = vcmp.le.s32.totalorder (!%p2376_p9), %v725_v3, %v723_v2 }
  0x60   : > { %v727_v5 = vsel (!%p2376_p9), %vm726_vm2, 0.0, %v2795_v4 }
  0x61   : > { %729 = vst.msk [vmem:[#allocation2] sm:$0xff] (!%p2376_p9), %vm728_vm1, %v727_v5 }
  0x63 PF: > { %vm733_vm3 = vcmask 261120   ;;  %v2632_v13 = vld [vmem:[%s3033_s30] sm:$0xff]   ;;  %v2796_v14 = vmov 0.0   ;;  %vm2797_vm4 = vmmov 0   ;;  %v2633_v15 = vld [vmem:[%s3033_s30 + $0x8] sm:$0xff]   ;;  %s3458_s16 = scalar_lea.vmem %s3393_s2, %s3023_s12  ;;  %s2798_s27 = smov 104   ;;  %v844_v37 = vlaneseq }
  0x64   : > { %v3084_v6 = vld [vmem:[%s3079_s7] sm:$0xff]  ;;  %2457 = vmatprep.subr.bf16.mxu0 %v2796_v14  ;;  %2461 = vmatprep.mubr.msk.bf16.mxu0 %vm2797_vm4, %v2796_v14  ;;  %s2801_s25 = smov 96   ;;  %v2802_v35 = vmov 1983009808   ;;  %v2803_v41 = vmov 1934713408   ;;  %s3459_s3 = scalar_lea.vmem %s3395_s4, %s3023_s12 }
  0x65   : > { %v734_v7 = vsel %vm733_vm3, %v3084_v6, 0.0  ;;  %2458 = vmatpush3.bf16.msra.mxu0 %v2632_v13  ;;  %2465 = vmatprep.subr.bf16.mxu1 %v2796_v14  ;;  %v2377_v20 = vld [vmem:[%s704_s18] ss:$0 sm:$0xff]  ;;  %s2800_s18 = smov 112   ;;  %v842_v36 = vunpack.c.l.s4 %v2802_v35  ;;  %v845_v39 = vshrl.u32 %v844_v37, 7  ;;  %v874_v42 = vunpack.c.l.s4 %v2803_v41  ;;  %s2804_s28 = smov 64  }
  0x66   : > { %735 = vadd.xlane.f32.xlu0 %v734_v7  ;;  %2459 = vmatprep.subr.bf16.mxu0 %v2796_v14  ;;  %v2378_v22 = vld [vmem:[%s707_s5] ss:$0 sm:$0xff]  ;;  %s2799_s5 = smov 120   ;;  %vm1284_vm5 = vcmask 64512   ;;  %vm1520_vm6 = vcmask 1043456   ;;  %s2806_s23 = smov 8  }
  0x67   : > { %2467 = vmatprep.mubr.msk.bf16.mxu1 %vm2797_vm4, %v2796_v14  ;;  %v2379_v26 = vld [vmem:[%s3458_s16] ss:$0 sm:$0xff]  ;;  %v843_v38 = vunpack.c.0.s8 %v842_v36  ;;  %v875_v49 = vunpack.c.0.s8 %v874_v42  ;;  %s2807_s13 = smov 24   ;;  %vm1851_vm7 = vcmask 130048   ;;  %vm1853_vm8 = vcmask 195584   ;;  %s3461_s16 = sld [smem:[#allocation26_spill]] }
  0x68   : > { %vm2060_vm9 = vcmask 523264   ;;  %p2415_p11 = scmp.ne.s32.totalorder %s2776_s21, 1 }
  0x69   : > { %2460 = vmatpush3.bf16.msra.mxu0 %v2633_v15  ;;  %v3137_v45 = vsub.s32 %v843_v38, %v845_v39  ;;  %v3147_v55 = vsub.s32 %v875_v49, %v845_v39 }
  0x6a   : > { %2471 = vmatprep.subr.bf16.mxu0 %v2796_v14 }
  0xf3   : > { %v736_v8 = vpop.xlane.xlu0 %735 }
  0xf4   : > { %v738_v9 = vmul.f32 0.03125, %v736_v8 }
  0xf6   : > { %v739_v10 = vsub.f32 %v3084_v6, %v738_v9 }
  0xf8   : > { %v740_v11 = vmul.f32 %v739_v10, %v739_v10 }
  0xfa   : > { %v741_v12 = vsel %vm733_vm3, %v740_v11, 0.0 }
  0xfb   : > { %742 = vadd.xlane.f32.xlu0 %v741_v12 }
 0x188   : > { %v743_v16 = vpop.xlane.xlu0 %742 }
 0x189   : > { %v744_v17 = vmul.f32 0.03125, %v743_v16 }
 0x18b   : > { %v745_v18 = vadd.f32 1e-05, %v744_v17 }
 0x18d   : > { %2642 = vrsqrt.f32 %v745_v18 }
 0x197   : > { %v2643_v19 = vpop.eup %2642 }
 0x198   : > { %v747_v21 = vmul.f32 %v2643_v19, %v739_v10 }
 0x19a   : > { %v754_v23 = vmul.f32 %v2377_v20, %v747_v21 }
 0x19c   : > { %v761_v24 = vadd.f32 %v2378_v22, %v754_v23 }
 0x19e   : > { %v762_v25 = vpack.c.bf16 %v761_v24, %v761_v24 }
 0x1a0   : > { %2462 = vmatmul.mubr.msk.bf16.vlgmr.msra.gmra.mrb[0].mxu0 %vm733_vm3, %v762_v25 }
 0x1a1   : > { %2473 = vmatprep.mubr.msk.bf16.mxu0 %vm2797_vm4, %v2796_v14 }
 0x273   : > { %v823_v27 = vpop.f32.mrb[0].mxu0 }
 0x274   : > { %v3118_v28 = vadd.f32 %v2379_v26, %v823_v27  ;;  %v2463_v29 = vpop.f32.mrb[1].mxu0 }
 0x275   : > { %v826_v30 = vpop.f32.mrb[2].mxu0 }
 0x276   : > { %836 = vrot.lane.b32.xlu0 %v3118_v28, %s2798_s27  ;;  %830 = vrot.lane.b32.xlu1 %v3118_v28, %s2799_s5  ;;  %v2464_v31 = vpop.f32.mrb[3].mxu0  ;;  %s3462_s27 = scalar_lea.vmem %s3461_s16, %s3023_s12 }
 0x27a   : > { %833 = vrot.lane.b32.xlu1 %v3118_v28, %s2800_s18 }
 0x27e   : > { %979 = vrot.lane.b32.xlu1 %v3118_v28, %s2801_s25 }
 0x2e8   : > { %v3124_v32 = vpop.permute.xlu1 %830  ;;  %v3130_v34 = vpop.permute.xlu0 %836 }
 0x2e9   : > { %981 = vrot.lane.b32.xlu1 %v3124_v32, %s2801_s25  ;;  %v855_v46 = vcombine.low %v3124_v32, %v3130_v34  ;;  %v856_v47 = vcombine.high %v3124_v32, %v3130_v34 }
 0x2eb   : > { %v863_v52 = vrot.slane %v855_v46, %v3137_v45  ;;  %v870_v53 = vrot.slane %v856_v47, %v3137_v45 }
 0x2ec   : > { %v3127_v33 = vpop.permute.xlu1 %833 }
 0x2ed   : > { %983 = vrot.lane.b32.xlu1 %v3127_v33, %s2801_s25  ;;  %v839_v43 = vcombine.low %v3118_v28, %v3127_v33  ;;  %v840_v44 = vcombine.high %v3118_v28, %v3127_v33 }
 0x2ef   : > { %v847_v50 = vrot.slane %v839_v43, %v3137_v45  ;;  %v854_v51 = vrot.slane %v840_v44, %v3137_v45 }
 0x2f0   : > { %v980_v40 = vpop.permute.xlu1 %979 }
 0x2f1   : > { %985 = vrot.lane.b32.xlu1 %v3130_v34, %s2801_s25  ;;  %v871_v56 = vcombine.low %v847_v50, %v863_v52  ;;  %v872_v57 = vcombine.high %v847_v50, %v863_v52  ;;  %v887_v58 = vcombine.low %v854_v51, %v870_v53  ;;  %v888_v59 = vcombine.high %v854_v51, %v870_v53 }
 0x2f3   : > { %v879_v1 = vrot.slane %v871_v56, %v3147_v55  ;;  %v886_v2 = vrot.slane %v872_v57, %v3147_v55  ;;  %v895_v3 = vrot.slane %v887_v58, %v3147_v55  ;;  %v902_v4 = vrot.slane %v888_v59, %v3147_v55 }
 0x2f5   : > { %v907_v15 = vcombine.low %v879_v1, %v886_v2  ;;  %v2383_v16 = vcombine.high %v879_v1, %v886_v2  ;;  %v923_v17 = vcombine.low %v895_v3, %v902_v4  ;;  %v2384_v18 = vcombine.high %v895_v3, %v902_v4 }
 0x2f7   : > { %v914_v27 = vrot.slane %v907_v15, %v3137_v45  ;;  %v922_v29 = vrot.slane %v2383_v16, %v3137_v45  ;;  %v930_v30 = vrot.slane %v923_v17, %v3137_v45  ;;  %v938_v31 = vrot.slane %v2384_v18, %v3137_v45  ;;  %v1283_v15 = vld [vmem:[#allocation2] sm:$0xff] }
 0x2f9   : > { %v939_v46 = vcombine.low %v914_v27, %v922_v29  ;;  %v955_v47 = vcombine.low %v930_v30, %v938_v31 }
 0x2fb   : > { %v963_v56 = vrot.slane %v955_v47, %v3147_v55 }
 0x35b   : > { %v982_v48 = vpop.permute.xlu1 %981 }
 0x35f   : > { %v984_v54 = vpop.permute.xlu1 %983 }
 0x360   : > { %v991_v60 = vcombine.low %v980_v40, %v984_v54  ;;  %v992_v61 = vcombine.high %v980_v40, %v984_v54  ;;  %v947_v54 = vrot.slane %v939_v46, %v3147_v55 }
 0x362   : > { %v999_v5 = vrot.slane %v991_v60, %v3137_v45  ;;  %v1006_v7 = vrot.slane %v992_v61, %v3137_v45  ;;  %v940_v61 = vcombine.high %v914_v27, %v922_v29 }
 0x363   : > { %v986_v62 = vpop.permute.xlu1 %985 }
 0x364   : > { %v1007_v63 = vcombine.low %v982_v48, %v986_v62  ;;  %v1008_v0 = vcombine.high %v982_v48, %v986_v62  ;;  %v956_v62 = vcombine.high %v930_v30, %v938_v31 }
 0x366   : > { %v1015_v8 = vrot.slane %v1007_v63, %v3137_v45  ;;  %v1022_v9 = vrot.slane %v1008_v0, %v3137_v45  ;;  %v971_v63 = vcombine.low %v947_v54, %v963_v56  ;;  %v972_v0 = vcombine.high %v947_v54, %v963_v56 }
 0x368   : > { %v1023_v10 = vcombine.low %v999_v5, %v1015_v8  ;;  %v1024_v11 = vcombine.high %v999_v5, %v1015_v8  ;;  %v1039_v12 = vcombine.low %v1006_v7, %v1022_v9  ;;  %v1040_v13 = vcombine.high %v1006_v7, %v1022_v9 }
 0x369   : > { %v975_v3 = vpack.c.bf16 %v971_v63, %v971_v63  ;;  %v976_v4 = vpack.c.bf16 %v972_v0, %v972_v0  ;;  %v954_v5 = vrot.slane %v940_v61, %v3147_v55  ;;  %v970_v7 = vrot.slane %v956_v62, %v3147_v55 }
 0x36a   : > { %v1031_v19 = vrot.slane %v1023_v10, %v3147_v55  ;;  %v1038_v20 = vrot.slane %v1024_v11, %v3147_v55  ;;  %v1047_v21 = vrot.slane %v1039_v12, %v3147_v55  ;;  %v1054_v22 = vrot.slane %v1040_v13, %v3147_v55 }
 0x36b   : > { %v973_v10 = vcombine.low %v954_v5, %v970_v7  ;;  %v974_v11 = vcombine.high %v954_v5, %v970_v7 }
 0x36c   : > { %v1059_v23 = vcombine.low %v1031_v19, %v1038_v20  ;;  %v2385_v24 = vcombine.high %v1031_v19, %v1038_v20  ;;  %v1075_v25 = vcombine.low %v1047_v21, %v1054_v22  ;;  %v2386_v26 = vcombine.high %v1047_v21, %v1054_v22 }
 0x36d   : > { %v977_v12 = vpack.c.bf16 %v973_v10, %v973_v10  ;;  %v978_v13 = vpack.c.bf16 %v974_v11, %v974_v11 }
 0x36e   : > { %v1066_v35 = vrot.slane %v1059_v23, %v3137_v45  ;;  %v1074_v36 = vrot.slane %v2385_v24, %v3137_v45  ;;  %v1082_v37 = vrot.slane %v1075_v25, %v3137_v45  ;;  %v1090_v38 = vrot.slane %v2386_v26, %v3137_v45 }
 0x370   : > { %v1091_v39 = vcombine.low %v1066_v35, %v1074_v36  ;;  %v1107_v40 = vcombine.low %v1082_v37, %v1090_v38  ;;  %v1092_v41 = vcombine.high %v1066_v35, %v1074_v36  ;;  %v1108_v42 = vcombine.high %v1082_v37, %v1090_v38 }
 0x372   : > { %v1099_v43 = vrot.slane %v1091_v39, %v3147_v55  ;;  %v1115_v44 = vrot.slane %v1107_v40, %v3147_v55  ;;  %v1106_v50 = vrot.slane %v1092_v41, %v3147_v55  ;;  %v1122_v51 = vrot.slane %v1108_v42, %v3147_v55 }
 0x374   : > { %v1123_v48 = vcombine.low %v1099_v43, %v1115_v44  ;;  %v1124_v49 = vcombine.high %v1099_v43, %v1115_v44  ;;  %v1125_v59 = vcombine.low %v1106_v50, %v1122_v51  ;;  %v1126_v60 = vcombine.high %v1106_v50, %v1122_v51 }
 0x376   : > { %v1127_v52 = vpack.c.bf16 %v1123_v48, %v1123_v48  ;;  %v1128_v53 = vpack.c.bf16 %v1124_v49, %v1124_v49  ;;  %v1129_v1 = vpack.c.bf16 %v1125_v59, %v1125_v59  ;;  %v1130_v2 = vpack.c.bf16 %v1126_v60, %v1126_v60 }
 0x378   : > { %v1289_v57 = vsel %vm1284_vm5, %v1127_v52, 0  ;;  %v1335_v58 = vsel %vm1284_vm5, %v1128_v53, 0  ;;  %v1381_v8 = vsel %vm1284_vm5, %v1129_v1, 0  ;;  %v1427_v9 = vsel %vm1284_vm5, %v1130_v2, 0 }
 0x379   : > { %2466 = vmatpush3.bf16.xpose.msra.mxu1 %v1289_v57  ;;  %2472 = vmatpush3.bf16.xpose.msra.mxu0 %v1335_v58 }
 0x37a   : > { %2477 = vmatprep.subr.bf16.mxu1 %v2796_v14  ;;  %2483 = vmatprep.subr.bf16.mxu0 %v2796_v14 }
 0x380   : > { %2468 = vmatmul.mubr.msk.bf16.vlgmr.msra.gmra.mrb[0].mxu1 %vm1284_vm5, %v975_v3  ;;  %2474 = vmatmul.mubr.msk.bf16.vlgmr.msra.gmra.mrb[4].mxu0 %vm1284_vm5, %v976_v4 }
 0x381   : > { %2478 = vmatpush3.bf16.xpose.msra.mxu1 %v1381_v8  ;;  %2484 = vmatpush3.bf16.xpose.msra.mxu0 %v1427_v9 }
 0x382   : > { %2479 = vmatprep.mubr.msk.bf16.mxu1 %vm2797_vm4, %v2796_v14  ;;  %2485 = vmatprep.mubr.msk.bf16.mxu0 %vm2797_vm4, %v2796_v14 }
 0x383   : > { %2489 = vmatprep.subr.bf16.mxu1 %v2796_v14  ;;  %2495 = vmatprep.subr.bf16.mxu0 %v2796_v14 }
 0x388   : > { %2480 = vmatmul.mubr.msk.bf16.vlgmr.msra.gmra.mrb[4].mxu1 %vm1284_vm5, %v977_v12  ;;  %2486 = vmatmul.mubr.msk.bf16.vlgmr.msra.gmra.mrb[8].mxu0 %vm1284_vm5, %v978_v13 }
 0x389   : > { %2491 = vmatprep.mubr.msk.bf16.mxu1 %vm2797_vm4, %v2796_v14  ;;  %2497 = vmatprep.mubr.msk.bf16.mxu0 %vm2797_vm4, %v2796_v14 }
 0x453   : > { %v1325_v16 = vpop.f32.mrb[0].mxu1  ;;  %v1371_v17 = vpop.f32.mrb[4].mxu0 }
 0x454   : > { %v1326_v18 = vadd.f32 %v1325_v16, %v1283_v15  ;;  %v1372_v19 = vadd.f32 %v1371_v17, %v1283_v15  ;;  %v2469_v20 = vpop.f32.mrb[1].mxu1  ;;  %v2475_v21 = vpop.f32.mrb[5].mxu0 }
 0x455   : > { %v1328_v22 = vpop.f32.mrb[2].mxu1  ;;  %v1374_v23 = vpop.f32.mrb[6].mxu0 }
 0x456   : > { %v2470_v24 = vpop.f32.mrb[3].mxu1  ;;  %v2476_v25 = vpop.f32.mrb[7].mxu0  ;;  %v1469_v26 = vsel %vm1284_vm5, %v1326_v18, -inf  ;;  %v1472_v27 = vsel %vm1284_vm5, %v1372_v19, -inf }
 0x457   : > { %1470 = vmax.xlane.f32.xlu1 %v1469_v26  ;;  %1473 = vmax.xlane.f32.xlu0 %v1472_v27 }
 0x45b   : > { %v1417_v29 = vpop.f32.mrb[4].mxu1  ;;  %v1463_v30 = vpop.f32.mrb[8].mxu0 }
 0x45c   : > { %v1418_v31 = vadd.f32 %v1417_v29, %v1283_v15  ;;  %v1464_v35 = vadd.f32 %v1463_v30, %v1283_v15  ;;  %v2481_v36 = vpop.f32.mrb[5].mxu1  ;;  %v2487_v37 = vpop.f32.mrb[9].mxu0 }
 0x45d   : > { %v1420_v38 = vpop.f32.mrb[6].mxu1  ;;  %v1466_v39 = vpop.f32.mrb[10].mxu0 }
 0x45e   : > { %v2482_v40 = vpop.f32.mrb[7].mxu1  ;;  %v2488_v41 = vpop.f32.mrb[11].mxu0  ;;  %v1475_v42 = vsel %vm1284_vm5, %v1418_v31, -inf  ;;  %v1478_v43 = vsel %vm1284_vm5, %v1464_v35, -inf }
 0x45f   : > { %1476 = vmax.xlane.f32.xlu1 %v1475_v42  ;;  %1479 = vmax.xlane.f32.xlu0 %v1478_v43 }
 0x470   : > { %1131 = vrot.lane.b32.xlu1 %v3118_v28, %s2804_s28 }
 0x4e4   : > { %v1471_v44 = vpop.xlane.xlu1 %1470  ;;  %v1474_v46 = vpop.xlane.xlu0 %1473 }
 0x4e5   : > { %v1481_v47 = vsub.f32 %v1326_v18, %v1471_v44  ;;  %v1482_v48 = vsub.f32 %v1372_v19, %v1474_v46 }
 0x4e7   : > { %v1485_v49 = vmul.f32 1.442695, %v1481_v47  ;;  %v1487_v50 = vmul.f32 1.442695, %v1482_v48 }
 0x4e9   : > { %2644 = vpow2.f32 %v1485_v49 }
 0x4ea   : > { %2646 = vpow2.f32 %v1487_v50 }
 0x4ec   : > { %v1477_v28 = vpop.xlane.xlu1 %1476  ;;  %v1480_v57 = vpop.xlane.xlu0 %1479 }
 0x4ed   : > { %v1483_v56 = vsub.f32 %v1418_v31, %v1477_v28  ;;  %v1484_v58 = vsub.f32 %v1464_v35, %v1480_v57 }
 0x4ef   : > { %v1489_v59 = vmul.f32 1.442695, %v1483_v56  ;;  %v1491_v60 = vmul.f32 1.442695, %v1484_v58 }
 0x4f1   : > { %2648 = vpow2.f32 %v1489_v59 }
 0x4f2   : > { %2650 = vpow2.f32 %v1491_v60 }
 0x4f3   : > { %v3202_v51 = vpop.eup %2644 }
 0x4f4   : > { %v3204_v52 = vpop.eup %2646  ;;  %v1493_v53 = vsel %vm1284_vm5, %v3202_v51, 0.0 }
 0x4f5   : > { %1494 = vadd.xlane.f32.xlu1 %v1493_v53  ;;  %v1496_v54 = vsel %vm1284_vm5, %v3204_v52, 0.0 }
 0x4f6   : > { %1497 = vadd.xlane.f32.xlu0 %v1496_v54 }
 0x4fb   : > { %v3213_v61 = vpop.eup %2648 }
 0x4fc   : > { %v3215_v62 = vpop.eup %2650  ;;  %v1499_v63 = vsel %vm1284_vm5, %v3213_v61, 0.0 }
 0x506   : > { %1135 = vrot.lane.b32.xlu1 %v3127_v33, %s2804_s28  ;;  %v1502_v33 = vsel %vm1284_vm5, %v3215_v62, 0.0 }
 0x50a   : > { %1137 = vrot.lane.b32.xlu1 %v3130_v34, %s2804_s28 }
 0x50c   : > { %1133 = vrot.lane.b32.xlu0 %v3124_v32, %s2804_s28  ;;  %v1132_v32 = vpop.permute.xlu1 %1131  ;;  %s3464_s28 = sld [smem:[#allocation30_spill]] (!%p2415_p11) }
 0x52b   : > { %1500 = vadd.xlane.f32.xlu0 %v1499_v63 }
 0x52e   : > { %1503 = vadd.xlane.f32.xlu1 %v1502_v33 }
 0x582   : > { %v1495_v34 = vpop.xlane.xlu1 %1494 }
 0x583   : > { %v1498_v0 = vpop.xlane.xlu0 %1497  ;;  %2652 = vrcp.f32 %v1495_v34 }
 0x584   : > { %2654 = vrcp.f32 %v1498_v0 }
 0x586   : > { %v1136_v1 = vpop.permute.xlu1 %1135 }
 0x587   : > { %v1143_v2 = vcombine.low %v1132_v32, %v1136_v1  ;;  %v1144_v3 = vcombine.high %v1132_v32, %v1136_v1  ;;  %v1134_v4 = vpop.permute.xlu0 %1133 }
 0x589   : > { %v1151_v9 = vrot.slane %v1143_v2, %v3137_v45  ;;  %v1158_v10 = vrot.slane %v1144_v3, %v3137_v45 }
 0x58a   : > { %v1138_v5 = vpop.permute.xlu1 %1137 }
 0x58b   : > { %v1159_v7 = vcombine.low %v1134_v4, %v1138_v5  ;;  %v1160_v8 = vcombine.high %v1134_v4, %v1138_v5  ;;  %v2634_v4 = vld [vmem:[%s3038_s24] sm:$0xff]  }
 0x58d   : > { %v1167_v11 = vrot.slane %v1159_v7, %v3137_v45  ;;  %v1174_v12 = vrot.slane %v1160_v8, %v3137_v45  ;;  %v2653_v40 = vpop.eup %2652 }
 0x58e   : > { %v2655_v43 = vpop.eup %2654  ;;  %v1509_v49 = vmul.f32 %v2653_v40, %v3202_v51 }
 0x58f   : > { %v1175_v13 = vcombine.low %v1151_v9, %v1167_v11  ;;  %v1176_v15 = vcombine.high %v1151_v9, %v1167_v11  ;;  %v1191_v16 = vcombine.low %v1158_v10, %v1174_v12  ;;  %v1192_v17 = vcombine.high %v1158_v10, %v1174_v12 }
 0x590   : > { %v1510_v50 = vmul.f32 %v2655_v43, %v3204_v52  ;;  %v1513_v59 = vpack.c.bf16 %v1509_v49, %v1509_v49 }
 0x591   : > { %v1183_v18 = vrot.slane %v1175_v13, %v3147_v55  ;;  %v1190_v19 = vrot.slane %v1176_v15, %v3147_v55  ;;  %v1199_v20 = vrot.slane %v1191_v16, %v3147_v55  ;;  %v1206_v21 = vrot.slane %v1192_v17, %v3147_v55 }
 0x592   : > { %v1514_v60 = vpack.c.bf16 %v1510_v50, %v1510_v50 }
 0x593   : > { %v1211_v22 = vcombine.low %v1183_v18, %v1190_v19  ;;  %v2387_v23 = vcombine.high %v1183_v18, %v1190_v19  ;;  %v1227_v24 = vcombine.low %v1199_v20, %v1206_v21  ;;  %v2388_v25 = vcombine.high %v1199_v20, %v1206_v21 }
 0x595   : > { %v1218_v26 = vrot.slane %v1211_v22, %v3137_v45  ;;  %v1226_v27 = vrot.slane %v2387_v23, %v3137_v45  ;;  %v1234_v29 = vrot.slane %v1227_v24, %v3137_v45  ;;  %v1242_v30 = vrot.slane %v2388_v25, %v3137_v45 }
 0x597   : > { %v1243_v31 = vcombine.low %v1218_v26, %v1226_v27  ;;  %v1244_v35 = vcombine.high %v1218_v26, %v1226_v27  ;;  %v1259_v36 = vcombine.low %v1234_v29, %v1242_v30  ;;  %v1260_v37 = vcombine.high %v1234_v29, %v1242_v30 }
 0x599   : > { %v1251_v38 = vrot.slane %v1243_v31, %v3147_v55  ;;  %v1258_v39 = vrot.slane %v1244_v35, %v3147_v55  ;;  %v1267_v41 = vrot.slane %v1259_v36, %v3147_v55  ;;  %v1274_v42 = vrot.slane %v1260_v37, %v3147_v55  ;;  %v2635_v37 = vld [vmem:[%s3038_s24 + $0x8] sm:$0xff]   ;;  %s2805_s24 = smov 16  }
 0x59b   : > { %v1275_v44 = vcombine.low %v1251_v38, %v1267_v41  ;;  %v1276_v46 = vcombine.high %v1251_v38, %v1267_v41  ;;  %v1277_v47 = vcombine.low %v1258_v39, %v1274_v42  ;;  %v1278_v48 = vcombine.high %v1258_v39, %v1274_v42 }
 0x59d   : > { %v1279_v53 = vpack.c.bf16 %v1275_v44, %v1275_v44  ;;  %v1280_v54 = vpack.c.bf16 %v1276_v46, %v1276_v46  ;;  %v1281_v57 = vpack.c.bf16 %v1277_v47, %v1277_v47  ;;  %v1282_v58 = vpack.c.bf16 %v1278_v48, %v1278_v48 }
 0x59f   : > { %v1522_v28 = vsel %vm1520_vm6, %v1279_v53, 0  ;;  %v1568_v56 = vsel %vm1520_vm6, %v1280_v54, 0  ;;  %v1614_v51 = vsel %vm1520_vm6, %v1281_v57, 0  ;;  %v1660_v52 = vsel %vm1520_vm6, %v1282_v58, 0 }
 0x5a0   : > { %2490 = vmatpush3.bf16.msra.mxu1 %v1522_v28  ;;  %2496 = vmatpush3.bf16.msra.mxu0 %v1568_v56 }
 0x5a1   : > { %2501 = vmatprep.subr.bf16.mxu1 %v2796_v14  ;;  %2507 = vmatprep.subr.bf16.mxu0 %v2796_v14 }
 0x5a3   : > { %2492 = vmatmul.mubr.msk.bf16.vlgmr.msra.gmra.mrb[8].mxu1 %vm1284_vm5, %v1513_v59  ;;  %2498 = vmatmul.mubr.msk.bf16.vlgmr.msra.gmra.mrb[12].mxu0 %vm1284_vm5, %v1514_v60 }
 0x5a4   : > { %2502 = vmatpush3.bf16.msra.mxu1 %v1614_v51  ;;  %2508 = vmatpush3.bf16.msra.mxu0 %v1660_v52 }
 0x5a5   : > { %2503 = vmatprep.mubr.msk.bf16.mxu1 %vm2797_vm4, %v2796_v14  ;;  %2509 = vmatprep.mubr.msk.bf16.mxu0 %vm2797_vm4, %v2796_v14 }
 0x5a6   : > { %2513 = vmatprep.subr.bf16.mxu1 %v2796_v14  ;;  %2521 = vmatprep.subr.bf16.mxu0 %v2796_v14 }
 0x5b8   : > { %v1501_v63 = vpop.xlane.xlu0 %1500 }
 0x5b9   : > { %2656 = vrcp.f32 %v1501_v63 }
 0x5bb   : > { %v1504_v33 = vpop.xlane.xlu1 %1503 }
 0x5bc   : > { %2658 = vrcp.f32 %v1504_v33 }
 0x5c3   : > { %v2657_v32 = vpop.eup %2656 }
 0x5c4   : > { %v1511_v34 = vmul.f32 %v2657_v32, %v3213_v61 }
 0x5c6   : > { %v2659_v0 = vpop.eup %2658  ;;  %v1515_v1 = vpack.c.bf16 %v1511_v34, %v1511_v34 }
 0x5c7   : > { %v1512_v2 = vmul.f32 %v2659_v0, %v3215_v62 }
 0x5c8   : > { %2504 = vmatmul.mubr.msk.bf16.vlgmr.msra.gmra.mrb[12].mxu1 %vm1284_vm5, %v1515_v1 }
 0x5c9   : > { %v1516_v3 = vpack.c.bf16 %v1512_v2, %v1512_v2  ;;  %2517 = vmatprep.mubr.msk.bf16.mxu1 %vm2797_vm4, %v2796_v14  ;;  %2514 = vmatpush3.bf16.msra.mxu1 %v2634_v4 }
 0x5ca   : > { %2515 = vmatprep.subr.bf16.mxu1 %v2796_v14 }
 0x5cb   : > { %2510 = vmatmul.mubr.msk.bf16.vlgmr.msra.gmra.mrb[16].mxu0 %vm1284_vm5, %v1516_v3  ;;  %v2399_v3 = vld [vmem:[%s3459_s3] ss:$0 sm:$0xff] }
 0x5cc   : > { %2525 = vmatprep.mubr.msk.bf16.mxu0 %vm2797_vm4, %v2796_v14 }
 0x5cd   : > { %2516 = vmatpush3.bf16.msra.mxu1 %v2635_v37 }
 0x5ce   : > { %2529 = vmatprep.subr.bf16.mxu1 %v2796_v14 }
 0x676   : > { %v1558_v61 = vpop.f32.mrb[8].mxu1  ;;  %v1604_v5 = vpop.f32.mrb[12].mxu0 }
 0x677   : > { %v2493_v7 = vpop.f32.mrb[9].mxu1  ;;  %v2499_v8 = vpop.f32.mrb[13].mxu0 }
 0x678   : > { %v1561_v62 = vpop.f32.mrb[10].mxu1  ;;  %v1607_v9 = vpop.f32.mrb[14].mxu0 }
 0x679   : > { %v2494_v10 = vpop.f32.mrb[11].mxu1  ;;  %v2500_v11 = vpop.f32.mrb[15].mxu0 }
 0x69b   : > { %v1650_v12 = vpop.f32.mrb[12].mxu1 }
 0x69c   : > { %v1702_v13 = vcombine.low %v1558_v61, %v1650_v12  ;;  %v1703_v15 = vcombine.high %v1558_v61, %v1650_v12  ;;  %v2505_v16 = vpop.f32.mrb[13].mxu1 }
 0x69d   : > { %v1653_v17 = vpop.f32.mrb[14].mxu1  ;;  %v2636_v16 = vld [vmem:[%s3047_s14] sm:$0xff]  }
 0x69e   : > { %v2506_v18 = vpop.f32.mrb[15].mxu1  ;;  %v1696_v19 = vpop.f32.mrb[16].mxu0  ;;  %v1710_v24 = vrot.slane %v1702_v13, %v3137_v45  ;;  %v1717_v25 = vrot.slane %v1703_v15, %v3137_v45  ;;  %2522 = vmatpush3.bf16.msra.mxu0 %v2636_v16  ;;  %v2637_v17 = vld [vmem:[%s3047_s14 + $0x8] sm:$0xff]  }
 0x69f   : > { %v1718_v20 = vcombine.low %v1604_v5, %v1696_v19  ;;  %v1719_v21 = vcombine.high %v1604_v5, %v1696_v19  ;;  %v2511_v22 = vpop.f32.mrb[17].mxu0  ;;  %2523 = vmatprep.subr.bf16.mxu0 %v2796_v14  ;;  %v2639_v18 = vld [vmem:[%s3057_s0 + $0x8] sm:$0xff]  }
 0x6a0   : > { %v1699_v23 = vpop.f32.mrb[18].mxu0 }
 0x6a1   : > { %v1726_v26 = vrot.slane %v1718_v20, %v3137_v45  ;;  %v1733_v27 = vrot.slane %v1719_v21, %v3137_v45  ;;  %v2512_v29 = vpop.f32.mrb[19].mxu0  ;;  %v2403_v23 = vld [vmem:[%s710_s15] ss:$0 sm:$0xff] }
 0x6a2   : > { %2524 = vmatpush3.bf16.msra.mxu0 %v2637_v17 }
 0x6a3   : > { %v1734_v30 = vcombine.low %v1710_v24, %v1726_v26  ;;  %v1735_v31 = vcombine.high %v1710_v24, %v1726_v26  ;;  %v1750_v35 = vcombine.low %v1717_v25, %v1733_v27  ;;  %v1751_v36 = vcombine.high %v1717_v25, %v1733_v27  ;;  %v2404_v25 = vld [vmem:[%s713_s22] ss:$0 sm:$0xff] }
 0x6a5   : > { %v1742_v38 = vrot.slane %v1734_v30, %v3147_v55  ;;  %v1749_v39 = vrot.slane %v1735_v31, %v3147_v55  ;;  %v1758_v40 = vrot.slane %v1750_v35, %v3147_v55  ;;  %v1765_v41 = vrot.slane %v1751_v36, %v3147_v55  ;;  %v2640_v30 = vld [vmem:[%s3057_s0 + $0x10] sm:$0xff]   ;;  %v2641_v31 = vld [vmem:[%s3057_s0 + $0x18] sm:$0xff]   ;;  %v2405_v35 = vld [vmem:[%s3462_s27] ss:$0 sm:$0xff] }
 0x6a7   : > { %v1770_v42 = vcombine.low %v1742_v38, %v1749_v39  ;;  %v2397_v43 = vcombine.high %v1742_v38, %v1749_v39  ;;  %v1786_v44 = vcombine.low %v1758_v40, %v1765_v41  ;;  %v2398_v46 = vcombine.high %v1758_v40, %v1765_v41 }
 0x6a9   : > { %v1777_v47 = vrot.slane %v1770_v42, %v3137_v45  ;;  %v1785_v48 = vrot.slane %v2397_v43, %v3137_v45  ;;  %v1793_v49 = vrot.slane %v1786_v44, %v3137_v45  ;;  %v1801_v50 = vrot.slane %v2398_v46, %v3137_v45 }
 0x6ab   : > { %v1803_v53 = vcombine.high %v1777_v47, %v1785_v48  ;;  %v1819_v54 = vcombine.high %v1793_v49, %v1801_v50  ;;  %v1802_v28 = vcombine.low %v1777_v47, %v1785_v48  ;;  %v1818_v56 = vcombine.low %v1793_v49, %v1801_v50 }
 0x6ad   : > { %v1817_v57 = vrot.slane %v1803_v53, %v3147_v55  ;;  %v1833_v58 = vrot.slane %v1819_v54, %v3147_v55  ;;  %v1810_v59 = vrot.slane %v1802_v28, %v3147_v55  ;;  %v1826_v60 = vrot.slane %v1818_v56, %v3147_v55 }
 0x6af   : > { %v1836_v51 = vcombine.low %v1817_v57, %v1833_v58  ;;  %v1835_v52 = vcombine.high %v1810_v59, %v1826_v60  ;;  %v1837_v63 = vcombine.high %v1817_v57, %v1833_v58  ;;  %v1834_v33 = vcombine.low %v1810_v59, %v1826_v60 }
 0x6b1   : > { %1843 = vrot.lane.b32.xlu1 %v1836_v51, %s2805_s24  ;;  %1839 = vrot.lane.b32.xlu0 %v1835_v52, %s2806_s23 }
 0x6b5   : > { %1847 = vrot.lane.b32.xlu0 %v1837_v63, %s2807_s13 }
 0x723   : > { %v1840_v45 = vpop.permute.xlu0 %1839  ;;  %v1844_v32 = vpop.permute.xlu1 %1843 }
 0x724   : > { %v1850_v34 = vsel %vm1284_vm5, %v1834_v33, %v1840_v45  ;;  %v2417_v33 = vld [vmem:[%s3464_s28] ss:$0 sm:$0xff] (!%p2415_p11) }
 0x725   : > { %v1852_v1 = vsel %vm1851_vm7, %v1850_v34, %v1844_v32 }
 0x727   : > { %v1848_v0 = vpop.permute.xlu0 %1847 }
 0x728   : > { %v1854_v55 = vsel %vm1853_vm8, %v1852_v1, %v1848_v0 }
 0x729   : > { %v1855_v2 = vpack.c.bf16 %v1854_v55, %v1854_v55 }
 0x72b   : > { %2518 = vmatmul.mubr.msk.bf16.vlgmr.msra.gmra.mrb[16].mxu1 %vm733_vm3, %v1855_v2 }
 0x72c   : > { %2537 = vmatprep.mubr.msk.bf16.mxu1 %vm2797_vm4, %v2796_v14 }
 0x7fe   : > { %v1916_v4 = vpop.f32.mrb[16].mxu1 }
 0x7ff   : > { %v1917_v61 = vadd.f32 %v2399_v3, %v1916_v4  ;;  %v2519_v5 = vpop.f32.mrb[17].mxu1 }
 0x800   : > { %v1919_v7 = vpop.f32.mrb[18].mxu1 }
 0x801   : > { %v1922_v8 = vadd.f32 %v1917_v61, %v3084_v6  ;;  %v2520_v62 = vpop.f32.mrb[19].mxu1  ;;  %v2638_v6 = vld [vmem:[%s3057_s0] sm:$0xff]  }
 0x802   : > { %2530 = vmatpush3.bf16.msra.mxu1 %v2638_v6 }
 0x803   : > { %v1925_v9 = vsel %vm733_vm3, %v1922_v8, 0.0  ;;  %2531 = vmatprep.subr.bf16.mxu1 %v2796_v14 }
 0x804   : > { %1926 = vadd.xlane.f32.xlu1 %v1925_v9 }
 0x806   : > { %2532 = vmatpush3.bf16.msra.mxu1 %v2639_v18 }
 0x807   : > { %2533 = vmatprep.subr.bf16.mxu1 %v2796_v14 }
 0x80a   : > { %2534 = vmatpush3.bf16.msra.mxu1 %v2640_v30 }
 0x80b   : > { %2535 = vmatprep.subr.bf16.mxu1 %v2796_v14  ;;  %v2409_v14 = vld [vmem:[%s701_s20] ss:$0 sm:$0xff]  ;;  %s3463_s20 = sld [smem:[#allocation29_spill]] (!%p2415_p11) }
 0x80e   : > { %2536 = vmatpush3.bf16.msra.mxu1 %v2641_v31 }
 0x811   : > { %v2416_v52 = vld [vmem:[%s3463_s20] ss:$0 sm:$0xff] (!%p2415_p11) }
 0x891   : > { %v1927_v10 = vpop.xlane.xlu1 %1926 }
 0x892   : > { %v1928_v11 = vmul.f32 0.03125, %v1927_v10 }
 0x894   : > { %v1929_v12 = vsub.f32 %v1922_v8, %v1928_v11 }
 0x896   : > { %v1930_v13 = vmul.f32 %v1929_v12, %v1929_v12 }
 0x898   : > { %v1931_v15 = vsel %vm733_vm3, %v1930_v13, 0.0 }
 0x899   : > { %1932 = vadd.xlane.f32.xlu0 %v1931_v15 }
 0x926   : > { %v1933_v19 = vpop.xlane.xlu0 %1932 }
 0x927   : > { %v1934_v20 = vmul.f32 0.03125, %v1933_v19 }
 0x929   : > { %v1935_v21 = vadd.f32 1e-05, %v1934_v20 }
 0x92b   : > { %2660 = vrsqrt.f32 %v1935_v21 }
 0x935   : > { %v2661_v22 = vpop.eup %2660 }
 0x936   : > { %v1937_v24 = vmul.f32 %v2661_v22, %v1929_v12 }
 0x938   : > { %v1944_v26 = vmul.f32 %v2403_v23, %v1937_v24 }
 0x93a   : > { %v1951_v27 = vadd.f32 %v2404_v25, %v1944_v26 }
 0x93c   : > { %v1952_v29 = vpack.c.bf16 %v1951_v27, %v1951_v27 }
 0x93e   : > { %2526 = vmatmul.mubr.msk.bf16.vlgmr.msra.gmra.mrb[20].mxu0 %vm733_vm3, %v1952_v29 }
 0xa11   : > { %v2013_v36 = vpop.f32.mrb[20].mxu0 }
 0xa12   : > { %v2014_v37 = vadd.f32 %v2405_v35, %v2013_v36  ;;  %v2527_v38 = vpop.f32.mrb[21].mxu0 }
 0xa13   : > { %v2016_v39 = vpop.f32.mrb[22].mxu0 }
 0xa14   : > { %v2019_v40 = vmax.f32 %v2014_v37, 0.0  ;;  %v2528_v41 = vpop.f32.mrb[23].mxu0 }
 0xa16   : > { %v2020_v42 = vpack.c.bf16 %v2019_v40, %v2019_v40 }
 0xa18   : > { %2538 = vmatmul.mubr.msk.bf16.vlgmr.msra.gmra.mrb[20].mxu1 %vm2060_vm9, %v2020_v42 }
 0xae8   : > { %2108 = sbr.rel (%p2415_p11) target bundleno = 3114 (0xc2a), region = 92 }
 0xaeb   : > { %v2098_v43 = vpop.f32.mrb[20].mxu1 }
 0xaec   : > { %v2099_v44 = vadd.f32 %v2409_v14, %v2098_v43  ;;  %v2539_v46 = vpop.f32.mrb[21].mxu1 }
 0xaed   : > { %v2101_v47 = vpop.f32.mrb[22].mxu1 }
 0xaee   : > { %v2104_v48 = vadd.f32 %v2099_v44, %v1922_v8  ;;  %v2540_v49 = vpop.f32.mrb[23].mxu1 }
 0xaf0   : > { %v2111_v50 = vsel %vm733_vm3, %v2104_v48, 0.0 }
 0xaf1   : > { %2112 = vadd.xlane.f32.xlu0 %v2111_v50 }
 0xb7e   : > { %v2113_v53 = vpop.xlane.xlu0 %2112 }
 0xb7f   : > { %v2114_v54 = vmul.f32 0.03125, %v2113_v53 }
 0xb81   : > { %v2115_v28 = vsub.f32 %v2104_v48, %v2114_v54 }
 0xb83   : > { %v2116_v56 = vmul.f32 %v2115_v28, %v2115_v28 }
 0xb85   : > { %v2117_v57 = vsel %vm733_vm3, %v2116_v56, 0.0 }
 0xb86   : > { %2118 = vadd.xlane.f32.xlu0 %v2117_v57 }
 0xc13   : > { %v2119_v58 = vpop.xlane.xlu0 %2118 }
 0xc14   : > { %v2120_v59 = vmul.f32 0.03125, %v2119_v58 }
 0xc16   : > { %v2121_v60 = vadd.f32 1e-05, %v2120_v59 }
 0xc18   : > { %2662 = vrsqrt.f32 %v2121_v60 }
 0xc22   : > { %v2663_v51 = vpop.eup %2662 }
 0xc23   : > { %v2123_v63 = vmul.f32 %v2663_v51, %v2115_v28 }
 0xc25   : > { %v2130_v45 = vmul.f32 %v2416_v52, %v2123_v63 }
 0xc27   : > { %v2137_v32 = vadd.f32 %v2417_v33, %v2130_v45 }
 0xc29   : > { %2138 = vst.msk [vmem:[%s3079_s7] sm:$0xff] %vm733_vm3, %v2137_v32 }
 0xc2a PF: > { %p2418_p0 = scmp.eq.s32.totalorder %s2776_s21, 1 }
 0xc2b   : > { %2143 = vst.msk [vmem:[%s3079_s7] sm:$0xff] (!%p2418_p0), %vm733_vm3, %v2104_v48 }
 0xc2c   : > { %2142 = sbr.rel (%p2418_p0) target bundleno = 3123 (0xc33), region = 96 }
 0xc33 PF: > { %s3465_s24 = sld [smem:[#allocation12_spill]]  ;;  %s3466_s23 = sld [smem:[#allocation21_spill]] }
 0xc34   : > { %s3467_s13 = sld [smem:[#allocation18_spill]]  ;;  %s3468_s14 = sld [smem:[#allocation31_spill]] }
 0xc35   : > { %s2158_s19 = sshll.u32 %s3079_s7, 4  ;;  %s2808_s21 = smov [#allocation6]   ;;  %s2159_s19 = int_to_ptr.vmem [resolvable:$true] %s2158_s19 }
 0xc36   : > { %s2694_s26 = scalar_lea.vmem %s2159_s19, 128  ;;  %s2698_s30 = sshll.u32 %s2808_s21, 4  ;;  %s2699_s30 = int_to_ptr.vmem [resolvable:$false] %s2698_s30 }
 0xc37   : > { %p2695_p7 = scmp.ne.s32.totalorder %s2159_s19, %s2694_s26  ;;  %s2700_s15 = scalar_lea.vmem %s2699_s30, 256 }
 0xc38   : > { %p2701_p3 = scmp.lt.s32.totalorder %s2159_s19, %s2699_s30  ;;  %p2702_p8 = scmp.lt.s32.totalorder %s2700_s15, %s2694_s26 }
 0xc39   : > { %s2420_s1 = sshll.u32 %s3465_s24, 7  ;;  %s2145_s29 = scalar_lea.sflag [#allocation5], %s3466_s23 }
 0xc3a   : > { %s3342_s6 = scalar_lea.hbm %s3468_s14, %s2420_s1  ;;  %p3469_p13 = scmp.ne.s32.totalorder %s3467_s13, 0 }
 0xc3b   : > { %p2703_p12 = por %p2702_p8, %p2701_p3 }
 0xc3c   : > { %p2696_p4 = pnand %p2695_p7, %p3469_p13 }
 0xc3e   : > { %p2697_p6 = pneg %p2696_p4 }
 0xc40   : > { %p2704_p1 = pnand %p2703_p12, %p2697_p6 }
 0xc42   : > { %2707 = shalt.err (!%p2704_p1)
}
 0xc43   : > { %s2708_s7 = scalar_lea.hbm %s3342_s6, 128  ;;  %s2712_s22 = scalar_lea.hbm %s3468_s14, 256 }
 0xc44   : > { %p2709_p2 = scmp.ne.s32.totalorder %s3342_s6, %s2708_s7  ;;  %p2713_p9 = scmp.lt.u32.totalorder %s3342_s6, %s3468_s14 }
 0xc45   : > { %p2714_p11 = scmp.lt.u32.totalorder %s2712_s22, %s2708_s7  ;;  %p2716_p7 = scmp.lt.u32.totalorder %s2708_s7, %s3342_s6 }
 0xc46   : > { %p2710_p5 = pnand %p2709_p2, %p3469_p13 }
 0xc47   : > { %p2715_p0 = por %p2714_p11, %p2713_p9 }
 0xc48   : > { %p2711_p10 = pneg %p2710_p5 }
 0xc49   : > { %p2717_p4 = por %p2716_p7, %p2715_p0 }
 0xc4b   : > { %p2718_p6 = pnand %p2717_p4, %p2711_p10 }
 0xc4d   : > { %2721 = shalt.err (!%p2718_p6)
}
 0xc4e   : > { %2543 = dma.vmem_to_hbm [thread:$0]  (%p3469_p13), %s2159_s19, 128, %s3342_s6, %s2145_s29  }
 0xc4f PF: > { %s3470_s0 = sld [smem:[#allocation15_spill]]  ;;  %s3471_s20 = sld [smem:[#allocation9_spill]] }
 0xc50   : > { %s3472_s18 = sld [smem:[#allocation19_spill]] }
 0xc55   : > { %p2554_p3 = scmp.ge.s32.totalorder %s3470_s0, 2  ;;  %s2170_s25 = sand.u32 1, %s3471_s20  }
 0xc56   : > { %p3473_p8 = scmp.ne.s32.totalorder %s3472_s18, 0  ;;  %s2171_s28 = scalar_lea.sflag [#allocation5], %s2170_s25 }
 0xc58   : > { %p2550_p12 = pnand %p2554_p3, %p3473_p8 }
 0xc5a   : > { %2759 = dma.done.wait (!%p2550_p12), %s2171_s28, 128  }
 0xc5b   : > { %2761 = vsyncadd (!%p2550_p12), %s2171_s28, 4294967168  ;;  %s31_s25 = sadd.s32 1, %s3470_s0   ;;  %s3474_s18 = sld [smem:[#allocation10_spill]] }
 0xc5c   : > { %p28_p1 = scmp.ge.s32.totalorder %s31_s25, 6   ;;  %s3475_s19 = sld [smem:[#allocation11_spill]] }
 0xc5d   : > { %s3476_s20 = sld [smem:[#allocation20_spill]]  ;;  %s3477_s21 = sld [smem:[#allocation13_spill]] }
 0xc5e   : > { %s3478_s22 = sld [smem:[#allocation14_spill]]  ;;  %s3479_s23 = sld [smem:[#allocation16_spill]] }
 0xc5f   : > { %s3480_s24 = sld [smem:[#allocation17_spill]]  ;;  %30 = sbr.rel (!%p28_p1) target bundleno = 18 (0x12), region = 173 }
 0xc66   :  { %2176 = vsyncpa [#allocation4], 1 }
 0xc67   :  { %2178 = vsyncpa [#allocation4 + $0x1], 1 }
 0xc68   :  { %2179 = vsyncpa [#allocation5], 1 }
 0xc69   :  { %2181 = vsyncpa [#allocation5 + $0x1], 1 }

</bundles_post_ra>
